<compile_context>
chip_gen: v6e
topology: v6e:2x2x1
jax: 0.10.0
libtpu: 0.0.40
codegen_flags: <defaults>
</compile_context>

<pallas_src>
import functools
import math

import jax
import jax.numpy as jnp
from jax import lax
from jax.experimental import pallas as pl
from jax.experimental.pallas import tpu as pltpu

_LANES = 128


def _contrastive_tile_kernel(data_i_ref, lab_i_ref, lab_j_ref, sq_j_ref,
                             emb_i_ref, emb_j_ref, out_ref, *,
                             margin, ignore_index):
    j = pl.program_id(1)

    di = data_i_ref[...]                        # (1, TM) f32  row-tile data
    li = lab_i_ref[...]                         # (1, TM) i32  row-tile labels
    lj = lab_j_ref[...]                         # (1, TN) i32  col-tile labels

    valid_i = li != ignore_index
    # miner_hard_neg: valid & (1 - labels).bool() & (data < margin)
    hard_f = (valid_i & (li != 1) & (di < margin)).astype(jnp.float32)   # (1,TM)
    # positives: valid & labels.bool()
    pos_j_f = ((lj != ignore_index) & (lj != 0)).astype(jnp.float32)     # (1,TN)

    ei = emb_i_ref[...]                         # (TM, D) f32
    ej = emb_j_ref[...]                         # (TN, D) f32

    # exact f32 row norms; column norms arrive lane-dense as sq_j (1,TN)
    sq_i = jnp.sum(ei * ei, axis=1, keepdims=True)                       # (TM,1)

    # Gram matmul in bf16 with f32 accumulation (MXU native)
    gram = lax.dot_general(ei.astype(jnp.bfloat16), ej.astype(jnp.bfloat16),
                           (((1,), (1,)), ((), ())),
                           preferred_element_type=jnp.float32)           # (TM,TN)

    d2 = jnp.maximum(sq_i + sq_j_ref[...] - 2.0 * gram, 0.0)
    dist = jnp.sqrt(d2)
    hinge = jnp.maximum(margin - dist, 0.0)
    h2 = hinge * hinge                                                   # (TM,TN)

    # masked pair reduction: hard rows folded in on the MXU, positive columns
    # applied on a single (1,TN) row.
    red = lax.dot_general(hard_f, h2, (((1,), (0,)), ((), ())),
                          preferred_element_type=jnp.float32)            # (1,TN)
    tile_neg = jnp.sum(red * pos_j_f, axis=1, keepdims=True)             # (1,1)

    lane = lax.broadcasted_iota(jnp.int32, (1, 1, _LANES), 2)
    neg_contrib = jnp.where(lane == 0, tile_neg, 0.0)                    # (1,1,L)

    @pl.when(j == 0)
    def _init():
        # per-row-tile, j-independent statistics (each element of the point
        # set appears in exactly one row tile).
        pos_i_f = (valid_i & (li != 0)).astype(jnp.float32)              # (1,TM)
        pos_sum = jnp.sum(pos_i_f * di * di, axis=1, keepdims=True)      # (1,1)
        pos_cnt = jnp.sum(pos_i_f, axis=1, keepdims=True)                # (1,1)
        hard_cnt = jnp.sum(hard_f, axis=1, keepdims=True)                # (1,1)
        out_ref[...] = (neg_contrib
                        + jnp.where(lane == 1, pos_sum, 0.0)
                        + jnp.where(lane == 2, pos_cnt, 0.0)
                        + jnp.where(lane == 3, hard_cnt, 0.0))

    @pl.when(j > 0)
    def _acc():
        out_ref[...] = out_ref[...] + neg_contrib


def contrastive_loss(data, embeddings, labels, *, margin=1.0,
                     weights=(1.0, 1.0), ignore_index=-1,
                     tile_m=256, tile_n=256):
    # ---- flatten exactly like the PyTorch forward -------------------------
    if data.ndim == 4:
        data = data.reshape(-1)
    if labels.ndim == 3:
        labels = labels.reshape(-1)
    data = data.astype(jnp.float32)
    labels = labels.astype(jnp.int32)
    emb = embeddings.astype(jnp.float32)
    n, d = emb.shape

    # ---- pad the point axis so it tiles evenly; padded points are ignored --
    step = math.lcm(tile_m, tile_n)
    n_pad = ((n + step - 1) // step) * step
    pad = n_pad - n
    if pad:
        data = jnp.pad(data, (0, pad))
        labels = jnp.pad(labels, (0, pad), constant_values=ignore_index)
        emb = jnp.pad(emb, ((0, pad), (0, 0)))

    data_row = data.reshape(1, n_pad)                       # lane-dense rows only
    lab_row = labels.reshape(1, n_pad)
    sq_row = jnp.sum(emb * emb, axis=1).reshape(1, n_pad)   # column norms (1,N)

    n_i = n_pad // tile_m
    n_j = n_pad // tile_n

    kernel = functools.partial(_contrastive_tile_kernel,
                               margin=float(margin),
                               ignore_index=int(ignore_index))

    partials = pl.pallas_call(
        kernel,
        out_shape=jax.ShapeDtypeStruct((n_i, 1, _LANES), jnp.float32),
        grid_spec=pltpu.PrefetchScalarGridSpec(
            num_scalar_prefetch=0,
            grid=(n_i, n_j),
            in_specs=[
                pl.BlockSpec((1, tile_m), lambda i, j: (0, i)),   # data  (rows)
                pl.BlockSpec((1, tile_m), lambda i, j: (0, i)),   # labels(rows)
                pl.BlockSpec((1, tile_n), lambda i, j: (0, j)),   # labels(cols)
                pl.BlockSpec((1, tile_n), lambda i, j: (0, j)),   # ||e||^2(cols)
                pl.BlockSpec((tile_m, d), lambda i, j: (i, 0)),   # emb   (rows)
                pl.BlockSpec((tile_n, d), lambda i, j: (j, 0)),   # emb   (cols)
            ],
            out_specs=pl.BlockSpec((1, 1, _LANES), lambda i, j: (i, 0, 0)),
        ),
        compiler_params=pltpu.CompilerParams(
            dimension_semantics=("parallel", "arbitrary")),
    )(data_row, lab_row, lab_row, sq_row, emb, emb)

    # ---- combine per-row-tile (per-core) partials; scalar weights hoisted --
    sums = jnp.sum(partials, axis=(0, 1))     # (128,)
    neg_sum, pos_sum, pos_cnt, hard_cnt = sums[0], sums[1], sums[2], sums[3]

    w0 = jnp.float32(weights[0])
    w1 = jnp.float32(weights[1])
    pos_loss = w1 * pos_sum / pos_cnt
    neg_loss = jnp.where(hard_cnt > 0.0,
                         w0 * neg_sum / (hard_cnt * pos_cnt), 0.0)
    return pos_loss + neg_loss


def _reference(data, embeddings, labels, margin=1.0, weights=(1.0, 1.0),
               ignore_index=-1):
    # pure-JAX reference mirroring the PyTorch forward (concrete bool indexing)
    data = data.reshape(-1)
    labels = labels.reshape(-1)
    valid = labels != ignore_index
    pos = valid & (labels != 0)
    neg = valid & (labels != 1)
    hard = neg & (data < margin)
    pos_samples = data[pos]
    pos_loss = jnp.mean(weights[1] * pos_samples ** 2)
    hard_embs = embeddings[hard]
    pos_embs = embeddings[pos]
    if hard_embs.shape[0] == 0:
        return pos_loss
    diff = hard_embs[:, None, :] - pos_embs[None, :, :]
    dist = jnp.sqrt(jnp.maximum(jnp.sum(diff * diff, axis=-1), 0.0))
    neg_loss = jnp.mean(weights[0] * jnp.maximum(margin - dist, 0.0) ** 2)
    return pos_loss + neg_loss


if __name__ == "__main__":
    key = jax.random.PRNGKey(0)
    k1, k2, k3, k4 = jax.random.split(key, 4)
    B, C, H, W, D = 2, 1, 16, 16, 32
    N = B * H * W

    # module __init__ defaults
    margin = 1.0
    weights = (1.0, 1.0)
    ignore_index = -1

    data = jax.random.uniform(k1, (B, C, H, W), jnp.float32)        # prediction map
    labels = jax.random.bernoulli(k2, 0.5, (B, H, W)).astype(jnp.int32)
    # sprinkle a few ignored pixels to exercise the valid mask
    labels = jnp.where(jax.random.bernoulli(k4, 0.1, (B, H, W)),
                       ignore_index, labels)
    # scale embeddings so pairwise distances straddle the margin (hinge active)
    embeddings = 0.15 * jax.random.normal(k3, (N, D), jnp.float32)

    loss = contrastive_loss(data, embeddings, labels, margin=margin,
                            weights=weights, ignore_index=ignore_index)
    loss = jax.block_until_ready(loss)

    ref = _reference(data, embeddings, labels, margin=margin,
                     weights=weights, ignore_index=ignore_index)
    assert jnp.allclose(loss, ref, rtol=1e-3, atol=2e-3), (loss, ref)
    print("KERNEL_OK")
</pallas_src>

<mosaic_0001>
module attributes {stable_mosaic.version = 11 : i64} {
  func.func @_contrastive_tile_kernel(%arg0: i32, %arg1: i32, %arg2: memref<1x256xf32, #tpu.memory_space<vmem>>, %arg3: memref<1x256xi32, #tpu.memory_space<vmem>>, %arg4: memref<1x256xi32, #tpu.memory_space<vmem>>, %arg5: memref<1x256xf32, #tpu.memory_space<vmem>>, %arg6: memref<256x32xf32, #tpu.memory_space<vmem>>, %arg7: memref<256x32xf32, #tpu.memory_space<vmem>>, %arg8: memref<1x1x128xf32, #tpu.memory_space<vmem>>) attributes {dimension_semantics = [#tpu.dimension_semantics<parallel>, #tpu.dimension_semantics<arbitrary>], iteration_bounds = array<i64: 2, 2>, scalar_prefetch = 0 : i64, scratch_operands = 0 : i64, tpu.core_type = #tpu.core_type<tc>, window_params = [{transform_indices = @transform_0, window_bounds = array<i64: 1, 256>}, {transform_indices = @transform_1, window_bounds = array<i64: 1, 256>}, {transform_indices = @transform_2, window_bounds = array<i64: 1, 256>}, {transform_indices = @transform_3, window_bounds = array<i64: 1, 256>}, {transform_indices = @transform_4, window_bounds = array<i64: 256, 32>}, {transform_indices = @transform_5, window_bounds = array<i64: 256, 32>}, {transform_indices = @transform_6, window_bounds = array<i64: 1, 1, 128>}]} {
    %c0 = arith.constant 0 : index
    %c0_0 = arith.constant 0 : index
    %0 = vector.load %arg2[%c0, %c0_0] : memref<1x256xf32, #tpu.memory_space<vmem>>, vector<1x256xf32>
    %c0_1 = arith.constant 0 : index
    %c0_2 = arith.constant 0 : index
    %1 = vector.load %arg3[%c0_1, %c0_2] : memref<1x256xi32, #tpu.memory_space<vmem>>, vector<1x256xi32>
    %c0_3 = arith.constant 0 : index
    %c0_4 = arith.constant 0 : index
    %2 = vector.load %arg4[%c0_3, %c0_4] : memref<1x256xi32, #tpu.memory_space<vmem>>, vector<1x256xi32>
    %c-1_i32 = arith.constant -1 : i32
    %3 = vector.broadcast %c-1_i32 : i32 to vector<1x256xi32>
    %4 = arith.cmpi ne, %1, %3 : vector<1x256xi32>
    %c1_i32 = arith.constant 1 : i32
    %5 = vector.broadcast %c1_i32 : i32 to vector<1x256xi32>
    %6 = arith.cmpi ne, %1, %5 : vector<1x256xi32>
    %7 = arith.andi %4, %6 : vector<1x256xi1>
    %cst = arith.constant 1.000000e+00 : f32
    %8 = vector.broadcast %cst : f32 to vector<1x256xf32>
    %9 = arith.cmpf olt, %0, %8 : vector<1x256xf32>
    %10 = arith.andi %7, %9 : vector<1x256xi1>
    %11 = arith.extui %10 : vector<1x256xi1> to vector<1x256xi32>
    %12 = arith.sitofp %11 : vector<1x256xi32> to vector<1x256xf32>
    %c-1_i32_5 = arith.constant -1 : i32
    %13 = vector.broadcast %c-1_i32_5 : i32 to vector<1x256xi32>
    %14 = arith.cmpi ne, %2, %13 : vector<1x256xi32>
    %c0_i32 = arith.constant 0 : i32
    %15 = vector.broadcast %c0_i32 : i32 to vector<1x256xi32>
    %16 = arith.cmpi ne, %2, %15 : vector<1x256xi32>
    %17 = arith.andi %14, %16 : vector<1x256xi1>
    %18 = arith.extui %17 : vector<1x256xi1> to vector<1x256xi32>
    %19 = arith.sitofp %18 : vector<1x256xi32> to vector<1x256xf32>
    %c0_6 = arith.constant 0 : index
    %c0_7 = arith.constant 0 : index
    %20 = vector.load %arg6[%c0_6, %c0_7] : memref<256x32xf32, #tpu.memory_space<vmem>>, vector<256x32xf32>
    %c0_8 = arith.constant 0 : index
    %c0_9 = arith.constant 0 : index
    %21 = vector.load %arg7[%c0_8, %c0_9] : memref<256x32xf32, #tpu.memory_space<vmem>>, vector<256x32xf32>
    %22 = arith.mulf %20, %20 : vector<256x32xf32>
    %cst_10 = arith.constant dense<0.000000e+00> : vector<256xf32>
    %23 = vector.multi_reduction <add>, %22, %cst_10 [1] : vector<256x32xf32> to vector<256xf32>
    %24 = vector.shape_cast %23 : vector<256xf32> to vector<256x1xf32>
    %25 = arith.truncf %20 : vector<256x32xf32> to vector<256x32xbf16>
    %26 = arith.truncf %21 : vector<256x32xf32> to vector<256x32xbf16>
    %cst_11 = arith.constant dense<0.000000e+00> : vector<256x256xf32>
    %27 = tpu.matmul %25, %26, %cst_11 {dimension_numbers = #tpu.dot_dimension_numbers<[1], [1], [0], [0], [0, 0, 1, 0], [], []>} : vector<256x32xbf16>, vector<256x32xbf16>, vector<256x256xf32> -> vector<256x256xf32>
    %c0_12 = arith.constant 0 : index
    %c0_13 = arith.constant 0 : index
    %28 = vector.load %arg5[%c0_12, %c0_13] : memref<1x256xf32, #tpu.memory_space<vmem>>, vector<1x256xf32>
    %29 = vector.broadcast %24 : vector<256x1xf32> to vector<256x256xf32>
    %30 = vector.broadcast %28 : vector<1x256xf32> to vector<256x256xf32>
    %31 = arith.addf %29, %30 : vector<256x256xf32>
    %cst_14 = arith.constant 2.000000e+00 : f32
    %32 = vector.broadcast %cst_14 : f32 to vector<256x256xf32>
    %33 = arith.mulf %32, %27 : vector<256x256xf32>
    %34 = arith.subf %31, %33 : vector<256x256xf32>
    %cst_15 = arith.constant 0.000000e+00 : f32
    %35 = vector.broadcast %cst_15 : f32 to vector<256x256xf32>
    %36 = arith.maximumf %34, %35 : vector<256x256xf32>
    %37 = math.sqrt %36 : vector<256x256xf32>
    %cst_16 = arith.constant 1.000000e+00 : f32
    %38 = vector.broadcast %cst_16 : f32 to vector<256x256xf32>
    %39 = arith.subf %38, %37 : vector<256x256xf32>
    %cst_17 = arith.constant 0.000000e+00 : f32
    %40 = vector.broadcast %cst_17 : f32 to vector<256x256xf32>
    %41 = arith.maximumf %39, %40 : vector<256x256xf32>
    %42 = arith.mulf %41, %41 : vector<256x256xf32>
    %cst_18 = arith.constant dense<0.000000e+00> : vector<1x256xf32>
    %43 = tpu.matmul %12, %42, %cst_18 {dimension_numbers = #tpu.dot_dimension_numbers<[1], [0], [0], [1], [0, 0, 1, 1], [], []>} : vector<1x256xf32>, vector<256x256xf32>, vector<1x256xf32> -> vector<1x256xf32>
    %44 = arith.mulf %43, %19 : vector<1x256xf32>
    %cst_19 = arith.constant dense<0.000000e+00> : vector<1xf32>
    %45 = vector.multi_reduction <add>, %44, %cst_19 [1] : vector<1x256xf32> to vector<1xf32>
    %46 = vector.shape_cast %45 : vector<1xf32> to vector<1x1xf32>
    %47 = tpu.iota {dimensions = array<i32: 2>} : vector<1x1x128xi32>
    %c0_i32_20 = arith.constant 0 : i32
    %48 = vector.broadcast %c0_i32_20 : i32 to vector<1x1x128xi32>
    %49 = arith.cmpi eq, %47, %48 : vector<1x1x128xi32>
    %cst_21 = arith.constant 0.000000e+00 : f32
    %50 = vector.shape_cast %46 : vector<1x1xf32> to vector<1x1x1xf32>
    %51 = vector.broadcast %50 : vector<1x1x1xf32> to vector<1x1x128xf32>
    %52 = vector.broadcast %cst_21 : f32 to vector<1x1x128xf32>
    %53 = arith.select %49, %51, %52 : vector<1x1x128xi1>, vector<1x1x128xf32>
    %c0_i32_22 = arith.constant 0 : i32
    %54 = arith.cmpi eq, %arg1, %c0_i32_22 : i32
    %55 = arith.extui %54 : i1 to i32
    %c0_i32_23 = arith.constant 0 : i32
    %56 = arith.cmpi ne, %55, %c0_i32_23 : i32
    scf.if %56 {
      %c0_i32_26 = arith.constant 0 : i32
      %60 = vector.broadcast %c0_i32_26 : i32 to vector<1x256xi32>
      %61 = arith.cmpi ne, %1, %60 : vector<1x256xi32>
      %62 = arith.andi %4, %61 : vector<1x256xi1>
      %63 = arith.extui %62 : vector<1x256xi1> to vector<1x256xi32>
      %64 = arith.sitofp %63 : vector<1x256xi32> to vector<1x256xf32>
      %65 = arith.mulf %64, %0 : vector<1x256xf32>
      %66 = arith.mulf %65, %0 : vector<1x256xf32>
      %cst_27 = arith.constant dense<0.000000e+00> : vector<1xf32>
      %67 = vector.multi_reduction <add>, %66, %cst_27 [1] : vector<1x256xf32> to vector<1xf32>
      %68 = vector.shape_cast %67 : vector<1xf32> to vector<1x1xf32>
      %cst_28 = arith.constant dense<0.000000e+00> : vector<1xf32>
      %69 = vector.multi_reduction <add>, %64, %cst_28 [1] : vector<1x256xf32> to vector<1xf32>
      %70 = vector.shape_cast %69 : vector<1xf32> to vector<1x1xf32>
      %cst_29 = arith.constant dense<0.000000e+00> : vector<1xf32>
      %71 = vector.multi_reduction <add>, %12, %cst_29 [1] : vector<1x256xf32> to vector<1xf32>
      %72 = vector.shape_cast %71 : vector<1xf32> to vector<1x1xf32>
      %c1_i32_30 = arith.constant 1 : i32
      %73 = vector.broadcast %c1_i32_30 : i32 to vector<1x1x128xi32>
      %74 = arith.cmpi eq, %47, %73 : vector<1x1x128xi32>
      %cst_31 = arith.constant 0.000000e+00 : f32
      %75 = vector.shape_cast %68 : vector<1x1xf32> to vector<1x1x1xf32>
      %76 = vector.broadcast %75 : vector<1x1x1xf32> to vector<1x1x128xf32>
      %77 = vector.broadcast %cst_31 : f32 to vector<1x1x128xf32>
      %78 = arith.select %74, %76, %77 : vector<1x1x128xi1>, vector<1x1x128xf32>
      %79 = arith.addf %53, %78 : vector<1x1x128xf32>
      %c2_i32 = arith.constant 2 : i32
      %80 = vector.broadcast %c2_i32 : i32 to vector<1x1x128xi32>
      %81 = arith.cmpi eq, %47, %80 : vector<1x1x128xi32>
      %cst_32 = arith.constant 0.000000e+00 : f32
      %82 = vector.shape_cast %70 : vector<1x1xf32> to vector<1x1x1xf32>
      %83 = vector.broadcast %82 : vector<1x1x1xf32> to vector<1x1x128xf32>
      %84 = vector.broadcast %cst_32 : f32 to vector<1x1x128xf32>
      %85 = arith.select %81, %83, %84 : vector<1x1x128xi1>, vector<1x1x128xf32>
      %86 = arith.addf %79, %85 : vector<1x1x128xf32>
      %c3_i32 = arith.constant 3 : i32
      %87 = vector.broadcast %c3_i32 : i32 to vector<1x1x128xi32>
      %88 = arith.cmpi eq, %47, %87 : vector<1x1x128xi32>
      %cst_33 = arith.constant 0.000000e+00 : f32
      %89 = vector.shape_cast %72 : vector<1x1xf32> to vector<1x1x1xf32>
      %90 = vector.broadcast %89 : vector<1x1x1xf32> to vector<1x1x128xf32>
      %91 = vector.broadcast %cst_33 : f32 to vector<1x1x128xf32>
      %92 = arith.select %88, %90, %91 : vector<1x1x128xi1>, vector<1x1x128xf32>
      %93 = arith.addf %86, %92 : vector<1x1x128xf32>
      %c0_34 = arith.constant 0 : index
      %c0_35 = arith.constant 0 : index
      %c0_36 = arith.constant 0 : index
      %94 = vector.load %arg8[%c0_34, %c0_35, %c0_36] : memref<1x1x128xf32, #tpu.memory_space<vmem>>, vector<1x1x128xf32>
      tpu.vector_store %arg8[%c0_34, %c0_35, %c0_36], %93 {strides = array<i32>} : memref<1x1x128xf32, #tpu.memory_space<vmem>>, vector<1x1x128xf32>,
    } else {
    }
    %c0_i32_24 = arith.constant 0 : i32
    %57 = arith.cmpi sgt, %arg1, %c0_i32_24 : i32
    %58 = arith.extui %57 : i1 to i32
    %c0_i32_25 = arith.constant 0 : i32
    %59 = arith.cmpi ne, %58, %c0_i32_25 : i32
    scf.if %59 {
      %c0_26 = arith.constant 0 : index
      %c0_27 = arith.constant 0 : index
      %c0_28 = arith.constant 0 : index
      %60 = vector.load %arg8[%c0_26, %c0_27, %c0_28] : memref<1x1x128xf32, #tpu.memory_space<vmem>>, vector<1x1x128xf32>
      %61 = arith.addf %60, %53 : vector<1x1x128xf32>
      %c0_29 = arith.constant 0 : index
      %c0_30 = arith.constant 0 : index
      %c0_31 = arith.constant 0 : index
      %62 = vector.load %arg8[%c0_29, %c0_30, %c0_31] : memref<1x1x128xf32, #tpu.memory_space<vmem>>, vector<1x1x128xf32>
      tpu.vector_store %arg8[%c0_29, %c0_30, %c0_31], %61 {strides = array<i32>} : memref<1x1x128xf32, #tpu.memory_space<vmem>>, vector<1x1x128xf32>,
    } else {
    }
    return
  }
  func.func @transform_0(%arg0: i32, %arg1: i32) -> (i32, i32) {
    %c0_i32 = arith.constant 0 : i32
    %c0_i32_0 = arith.constant 0 : i32
    return %c0_i32, %arg0 : i32, i32
  }
  func.func @transform_1(%arg0: i32, %arg1: i32) -> (i32, i32) {
    %c0_i32 = arith.constant 0 : i32
    %c0_i32_0 = arith.constant 0 : i32
    return %c0_i32, %arg0 : i32, i32
  }
  func.func @transform_2(%arg0: i32, %arg1: i32) -> (i32, i32) {
    %c0_i32 = arith.constant 0 : i32
    %c0_i32_0 = arith.constant 0 : i32
    return %c0_i32, %arg1 : i32, i32
  }
  func.func @transform_3(%arg0: i32, %arg1: i32) -> (i32, i32) {
    %c0_i32 = arith.constant 0 : i32
    %c0_i32_0 = arith.constant 0 : i32
    return %c0_i32, %arg1 : i32, i32
  }
  func.func @transform_4(%arg0: i32, %arg1: i32) -> (i32, i32) {
    %c0_i32 = arith.constant 0 : i32
    %c0_i32_0 = arith.constant 0 : i32
    return %arg0, %c0_i32 : i32, i32
  }
  func.func @transform_5(%arg0: i32, %arg1: i32) -> (i32, i32) {
    %c0_i32 = arith.constant 0 : i32
    %c0_i32_0 = arith.constant 0 : i32
    return %arg1, %c0_i32 : i32, i32
  }
  func.func @transform_6(%arg0: i32, %arg1: i32) -> (i32, i32, i32) {
    %c0_i32 = arith.constant 0 : i32
    %c0_i32_0 = arith.constant 0 : i32
    %c0_i32_1 = arith.constant 0 : i32
    return %arg0, %c0_i32, %c0_i32_0 : i32, i32, i32
  }
}

</mosaic_0001>

<bundles_post_ra>
// kernel: tpu_custom_call.1
= control target key start
LH: loop header
LB: loop body
LE: loop exit
PB: predicated region body
PF: predicated region fallthrough
CT: control target
= control target key end

     0   :  { %11 = vsyncpa [#allocation3], 0  ;;  %s3990_s0 = inlined_call_operand.vmem [shape: f32[1,512], index: 0, kind: input, shape index: {}]   ;;  %s3991_s1 = inlined_call_operand.vmem [shape: s32[1,512], index: 1, kind: input, shape index: {}]   ;;  %s3992_s2 = inlined_call_operand.vmem [shape: s32[1,512], index: 2, kind: input, shape index: {}]   ;;  %s3993_s3 = inlined_call_operand.vmem [shape: f32[1,512], index: 3, kind: input, shape index: {}]   ;;  %s3994_s4 = inlined_call_operand.vmem [shape: f32[512,32], index: 4, kind: input, shape index: {}]   ;;  %s3995_s5 = inlined_call_operand.vmem [shape: f32[512,32], index: 5, kind: input, shape index: {}]   ;;  %s3996_s6 = inlined_call_operand.hbm [shape: f32[2,1,128], index: 6, kind: output, shape index: {}]  }
   0x1   :  { %13 = vsyncpa [#allocation3 + $0x1], 0  ;;  %s2545_s21 = smov 0   ;;  %s2547_s22 = smov 0  }
   0x2   :  { %s2549_s23 = smov 0   ;;  %s2551_s24 = smov 0  }
   0x3   :  { %s2553_s25 = smov 0   ;;  %s2555_s26 = smov 0  }
   0x4   :  { %s2557_s27 = smov 0   ;;  %s2559_s28 = smov 0  }
   0x5 LB: > { %s2095_s29 = sadd.s32 4294967295, %s2505_s28   ;;  %s2096_s30 = sadd.s32 4294967294, %s2505_s28   ;;  %s2505_s28 = sphi %s2559_s28, %s19_s28   ;;  %s2501_s27 = sphi %s2557_s27, %s4271_s27   ;;  %s2497_s26 = sphi %s2555_s26, %s4270_s26   ;;  %s2493_s25 = sphi %s2553_s25, %s4269_s25   ;;  %s2489_s24 = sphi %s2551_s24, %s4268_s24   ;;  %s2485_s23 = sphi %s2549_s23, %s4267_s23   ;;  %s2481_s22 = sphi %s2547_s22, %s4266_s22   ;;  %s2477_s21 = sphi %s2545_s21, %s4265_s21  }
   0x6   : > { %s28_s7 = sadd.s32 1, %s2497_s26  ;;  %s31_s8 = sadd.s32 1, %s2501_s27 }
   0x7   : > { %p29_p0 = scmp.ge.s32.totalorder %s28_s7, 2  ;;  %p204_p1 = scmp.ne.s32.totalorder %s2485_s23, %s2481_s22 }
   0x8   : > { %p205_p2 = scmp.eq.s32.totalorder %s2095_s29, 3  ;;  %p210_p4 = scmp.ne.s32.totalorder %s2481_s22, %s2477_s21 }
   0x9   : > { %s4273_s7 = smov (%p29_p0, %s28_s7), 0  ;;  %s4275_s8 = smov (!%p29_p0, %s31_s8), %s2501_s27 }
   0xa   : > { %p2594_p3 = por %p205_p2, %p204_p1  ;;  %p33_p5 = scmp.ge.s32.totalorder %s4275_s8, 2 }
   0xb   : > { %p211_p6 = scmp.eq.s32.totalorder %s2096_s30, 3  ;;  %p2099_p7 = scmp.ge.s32.totalorder %s2505_s28, 1 }
   0xc   : > { %p279_p8 = scmp.lt.s32.totalorder %s2505_s28, 5  ;;  %s4277_s8 = smov (%p33_p5, %s4275_s8), 0 }
   0xd   : > { %p2604_p9 = por %p211_p6, %p210_p4  ;;  %s191_s11 = ssub.s32 %s2501_s27, %s4277_s8 }
   0xe   : > { %p280_p10 = pnand %p2099_p7, %p279_p8  ;;  %s194_s12 = sadd.s32 1, %s2485_s23 }
   0xf   : > { %p192_p11 = scmp.eq.s32.totalorder %s191_s11, 0 }
  0x10   : > { %283 = sbr.rel (%p280_p10) target bundleno = 1039 (0x40f), region = 44 }
  0x11   : > { %s2612_s13 = scalar_select %p192_p11, %s2485_s23, %s194_s12  }
  0x15   : > { %s327_s14 = sand.u32 1, %s2481_s22   ;;  %s2106_s15 = sshll.u32 %s2489_s24, 5  ;;  %vm473_vm0 = vcmask 261120  }
  0x16   : > { %p356_p12 = scmp.lt.s32.totalorder %s2106_s15, 63  ;;  %s2104_s16 = sshll.u32 %s2493_s25, 5 }
  0x17   : > { %p350_p13 = scmp.lt.s32.totalorder %s2104_s16, 63  ;;  %s2100_s19 = sshll.u32 %s2493_s25, 1 }
  0x18   : > { %s4279_s15 = smov (!%p356_p12, %s2106_s15), 63  ;;  %p3854_p1 = scmp.lt.s32.totalorder %s2100_s19, 3 }
  0x19   : > { %s2107_s17 = sshll.u32 %s4279_s15, 3  ;;  %s4281_s16 = smov (!%p350_p13, %s2104_s16), 63 }
  0x1a   : > { %s2620_s20 = scalar_lea.vmem %s3995_s5, %s2107_s17  ;;  %s2105_s29 = sshll.u32 %s4281_s16, 3 }
  0x1b   : > { %v439_v0 = vld [vmem:[%s2620_s20 + $0xf0] sm:$0xff]  ;;  %v440_v1 = vld [vmem:[%s2620_s20 + $0xf8] sm:$0xff]  ;;  %v437_v5 = vld [vmem:[%s2620_s20 + $0xe0] sm:$0xff]  ;;  %s2640_s12 = scalar_lea.vmem %s3994_s4, %s2105_s29  ;;  %s2102_s15 = sshll.u32 %s2489_s24, 1 }
  0x1c   : > { %v423_v2 = vld [vmem:[%s2620_s20 + $0x70] sm:$0xff]  ;;  %v601_v3 = vpack.c.bf16 %v440_v1, %v439_v0  ;;  %v424_v4 = vld [vmem:[%s2620_s20 + $0x78] sm:$0xff]  ;;  %v438_v6 = vld [vmem:[%s2620_s20 + $0xe8] sm:$0xff]  ;;  %p340_p0 = scmp.lt.s32.totalorder %s2102_s15, 3  ;;  %s4285_s19 = smov (!%p3854_p1, %s2100_s19), 3 }
  0x1d   : > { %v593_v7 = vpack.c.bf16 %v424_v4, %v423_v2  ;;  %v600_v8 = vpack.c.bf16 %v438_v6, %v437_v5  ;;  %v421_v9 = vld [vmem:[%s2620_s20 + $0x60] sm:$0xff]  ;;  %v422_v10 = vld [vmem:[%s2620_s20 + $0x68] sm:$0xff]  ;;  %v435_v13 = vld [vmem:[%s2620_s20 + $0xd0] sm:$0xff]  ;;  %s332_s11 = scalar_lea.vmem %s3990_s0, %s4285_s19  ;;  %s337_s17 = scalar_lea.vmem %s3991_s1, %s4285_s19 }
  0x1e   : > { %2196 = vmatprep.subr.msk.bf16.mxu0 %vm473_vm0, %v601_v3  ;;  %2197 = vmatprep.subr.msk.bf16.mxu1 %vm473_vm0, %v601_v3  ;;  %v592_v12 = vpack.c.bf16 %v422_v10, %v421_v9  ;;  %v436_v14 = vld [vmem:[%s2620_s20 + $0xd8] sm:$0xff]  ;;  %v419_v17 = vld [vmem:[%s2620_s20 + $0x50] sm:$0xff]  ;;  %v2646_v19 = vld [vmem:[%s2640_s12] sm:$0xff]  ;;  %s4283_s15 = smov (!%p340_p0, %s2102_s15), 3  ;;  %p2126_p2 = scmp.ne.s32.totalorder %s2489_s24, 0 }
  0x1f   : > { %v672_v11 = vsel %vm473_vm0, %v593_v7, 0  ;;  %v599_v16 = vpack.c.bf16 %v436_v14, %v435_v13  ;;  %v420_v18 = vld [vmem:[%s2620_s20 + $0x58] sm:$0xff]  ;;  %v2649_v20 = vld [vmem:[%s2640_s12 + $0x8] sm:$0xff]  ;;  %v2656_v22 = vld [vmem:[%s2640_s12 + $0x80] sm:$0xff]  ;;  %s347_s18 = scalar_lea.vmem %s3993_s3, %s4283_s15 }
  0x20   : > { %2133 = vmatpush3.bf16.xpose.msra.mxu0 %v672_v11  ;;  %2188 = vmatpush3.bf16.xpose.msra.mxu1 %v672_v11  ;;  %v669_v15 = vsel %vm473_vm0, %v592_v12, 0  ;;  %v2653_v21 = vpack.c.bf16 %v2649_v20, %v2646_v19  ;;  %v2659_v23 = vld [vmem:[%s2640_s12 + $0x88] sm:$0xff]  ;;  %v392_v24 = vld [vmem:[%s2640_s12 + $0x78] sm:$0xff]  ;;  %v591_v25 = vpack.c.bf16 %v420_v18, %v419_v17  ;;  %v391_v29 = vld [vmem:[%s2640_s12 + $0x70] sm:$0xff] }
  0x21   : > { %2198 = vmatprep.subr.msk.bf16.mxu0 %vm473_vm0, %v600_v8  ;;  %2199 = vmatprep.subr.msk.bf16.mxu1 %vm473_vm0, %v600_v8  ;;  %v2664_v26 = vpack.c.bf16 %v2659_v23, %v2656_v22  ;;  %v456_v27 = vmul.f32 %v392_v24, %v392_v24  ;;  %v390_v28 = vld [vmem:[%s2640_s12 + $0x68] sm:$0xff]  ;;  %v389_v30 = vld [vmem:[%s2640_s12 + $0x60] sm:$0xff]  ;;  %v455_v32 = vmul.f32 %v391_v29, %v391_v29  ;;  %v388_v38 = vld [vmem:[%s2640_s12 + $0x58] sm:$0xff] }
  0x22   : > { %v454_v31 = vmul.f32 %v390_v28, %v390_v28  ;;  %v2671_v33 = vpack.c.bf16 %v392_v24, %v391_v29  ;;  %v433_v34 = vld [vmem:[%s2620_s20 + $0xc0] sm:$0xff]  ;;  %v434_v35 = vld [vmem:[%s2620_s20 + $0xc8] sm:$0xff]  ;;  %2148 = vmatprep.mubr.msk.bf16.mxu0 %vm473_vm0, %v2653_v21  ;;  %v2680_v37 = vpack.c.bf16 %v390_v28, %v389_v30  ;;  %v453_v40 = vmul.f32 %v389_v30, %v389_v30  ;;  %v387_v41 = vld [vmem:[%s2640_s12 + $0x50] sm:$0xff] }
  0x23   : > { %2164 = vmatprep.mubr.msk.bf16.mxu1 %vm473_vm0, %v2664_v26  ;;  %v519_v36 = vsel %vm473_vm0, %v456_v27, 0.0  ;;  %v516_v42 = vsel %vm473_vm0, %v455_v32, 0.0  ;;  %v452_v43 = vmul.f32 %v388_v38, %v388_v38  ;;  %v2686_v44 = vpack.c.bf16 %v388_v38, %v387_v41  ;;  %v2690_v47 = vld [vmem:[%s2640_s12 + $0x48] sm:$0xff]  ;;  %v417_v48 = vld [vmem:[%s2620_s20 + $0x40] sm:$0xff]  ;;  %v431_v56 = vld [vmem:[%s2620_s20 + $0xb0] sm:$0xff] }
  0x24   : > { %520 = vadd.xlane.f32.xlu0 %v519_v36  ;;  %v513_v39 = vsel %vm473_vm0, %v454_v31, 0.0  ;;  %v666_v45 = vsel %vm473_vm0, %v591_v25, 0  ;;  %v598_v46 = vpack.c.bf16 %v434_v35, %v433_v34  ;;  %v418_v49 = vld [vmem:[%s2620_s20 + $0x48] sm:$0xff]  ;;  %v510_v50 = vsel %vm473_vm0, %v453_v40, 0.0  ;;  %v2699_v54 = vld [vmem:[%s2640_s12 + $0x40] sm:$0xff]  ;;  %v432_v57 = vld [vmem:[%s2620_s20 + $0xb8] sm:$0xff] }
  0x25   : > { %514 = vadd.xlane.f32.xlu1 %v513_v39  ;;  %v451_v51 = vmul.f32 %v387_v41, %v387_v41  ;;  %v507_v52 = vsel %vm473_vm0, %v452_v43, 0.0  ;;  %v450_v53 = vmul.f32 %v2690_v47, %v2690_v47  ;;  %v590_v55 = vpack.c.bf16 %v418_v49, %v417_v48  ;;  %v408_v58 = vld [vmem:[%s2640_s12 + $0xf8] sm:$0xff]  ;;  %v2707_v59 = vld [vmem:[%s2640_s12 + $0xf0] sm:$0xff]  ;;  %v2728_v7 = vld [vmem:[%s2640_s12 + $0x28] sm:$0xff] }
  0x26   : > { %v449_v61 = vmul.f32 %v2699_v54, %v2699_v54  ;;  %v2713_v62 = vld [vmem:[%s2640_s12 + $0x38] sm:$0xff]  ;;  %v2716_v63 = vpack.c.bf16 %v408_v58, %v2707_v59  ;;  %v597_v3 = vpack.c.bf16 %v432_v57, %v431_v56  ;;  %v415_v4 = vld [vmem:[%s2620_s20 + $0x30] sm:$0xff]  ;;  %v446_v11 = vmul.f32 %v2728_v7, %v2728_v7  ;;  %v429_v13 = vld [vmem:[%s2620_s20 + $0xa0] sm:$0xff] }
  0x27   : > { %v504_v60 = vsel %vm473_vm0, %v451_v51, 0.0  ;;  %v501_v0 = vsel %vm473_vm0, %v450_v53, 0.0  ;;  %v448_v1 = vmul.f32 %v2713_v62, %v2713_v62  ;;  %v663_v2 = vsel %vm473_vm0, %v590_v55, 0  ;;  %v416_v5 = vld [vmem:[%s2620_s20 + $0x38] sm:$0xff]  ;;  %v2725_v6 = vld [vmem:[%s2640_s12 + $0x30] sm:$0xff]  ;;  %v430_v14 = vld [vmem:[%s2620_s20 + $0xa8] sm:$0xff] }
  0x28   : > { %2135 = vmatpush3.bf16.xpose.msra.mxu0 %v669_v15  ;;  %2189 = vmatpush3.bf16.xpose.msra.mxu1 %v669_v15  ;;  %v498_v8 = vsel %vm473_vm0, %v449_v61, 0.0  ;;  %v447_v9 = vmul.f32 %v2725_v6, %v2725_v6  ;;  %v589_v12 = vpack.c.bf16 %v416_v5, %v415_v4  ;;  %v2741_v15 = vld [vmem:[%s2640_s12 + $0x20] sm:$0xff]  ;;  %v489_v24 = vsel %vm473_vm0, %v446_v11, 0.0  ;;  %v414_v30 = vld [vmem:[%s2620_s20 + $0x28] sm:$0xff]  ;;  %v2756_v31 = vld [vmem:[%s2640_s12 + $0x10] sm:$0xff] }
  0x29   : > { %2200 = vmatprep.subr.msk.bf16.mxu0 %vm473_vm0, %v599_v16  ;;  %2201 = vmatprep.subr.msk.bf16.mxu1 %vm473_vm0, %v599_v16  ;;  %v495_v10 = vsel %vm473_vm0, %v448_v1, 0.0  ;;  %v2744_v16 = vld [vmem:[%s2640_s12 + $0x18] sm:$0xff]  ;;  %v445_v18 = vmul.f32 %v2741_v15, %v2741_v15  ;;  %v596_v28 = vpack.c.bf16 %v430_v14, %v429_v13  ;;  %v413_v29 = vld [vmem:[%s2620_s20 + $0x20] sm:$0xff]  ;;  %v443_v34 = vmul.f32 %v2756_v31, %v2756_v31  ;;  %v427_v39 = vld [vmem:[%s2620_s20 + $0x90] sm:$0xff] }
  0x2a   : > { %517 = vadd.xlane.f32.xlu0 %v516_v42  ;;  %511 = vadd.xlane.f32.xlu1 %v510_v50  ;;  %v492_v17 = vsel %vm473_vm0, %v447_v9, 0.0  ;;  %v444_v25 = vmul.f32 %v2744_v16, %v2744_v16  ;;  %v660_v27 = vsel %vm473_vm0, %v589_v12, 0  ;;  %v442_v36 = vmul.f32 %v2649_v20, %v2649_v20  ;;  %v428_v40 = vld [vmem:[%s2620_s20 + $0x98] sm:$0xff]  ;;  %v2774_v48 = vld [vmem:[%s2640_s12 + $0xe8] sm:$0xff]  ;;  %v411_v49 = vld [vmem:[%s2620_s20 + $0x10] sm:$0xff] }
  0x2b   : > { %v486_v32 = vsel %vm473_vm0, %v445_v18, 0.0  ;;  %v588_v38 = vpack.c.bf16 %v414_v30, %v413_v29  ;;  %v480_v41 = vsel %vm473_vm0, %v443_v34, 0.0  ;;  %v441_v42 = vmul.f32 %v2646_v19, %v2646_v19  ;;  %v412_v50 = vld [vmem:[%s2620_s20 + $0x18] sm:$0xff]  ;;  %v2785_v55 = vld [vmem:[%s2640_s12 + $0xe0] sm:$0xff]  ;;  %v2799_v1 = vld [vmem:[%s2640_s12 + $0xd0] sm:$0xff] }
  0x2c   : > { %v483_v35 = vsel %vm473_vm0, %v444_v25, 0.0  ;;  %v477_v43 = vsel %vm473_vm0, %v442_v36, 0.0  ;;  %v471_v19 = vmul.f32 %v2707_v59, %v2707_v59  ;;  %v470_v53 = vmul.f32 %v2774_v48, %v2774_v48  ;;  %v2790_v57 = vld [vmem:[%s2640_s12 + $0xd8] sm:$0xff]  ;;  %v426_v59 = vld [vmem:[%s2620_s20 + $0x88] sm:$0xff]  ;;  %v409_v5 = vld [vmem:[%s2620_s20] sm:$0xff] }
  0x2d   : > { %v657_v20 = vsel %vm473_vm0, %v588_v38, 0  ;;  %v474_v51 = vsel %vm473_vm0, %v441_v42, 0.0  ;;  %v587_v56 = vpack.c.bf16 %v412_v50, %v411_v49  ;;  %v469_v61 = vmul.f32 %v2785_v55, %v2785_v55  ;;  %v2807_v9 = vld [vmem:[%s2640_s12 + $0xc8] sm:$0xff]  ;;  %v400_v18 = vld [vmem:[%s2640_s12 + $0xb8] sm:$0xff]  ;;  %v399_v30 = vld [vmem:[%s2640_s12 + $0xb0] sm:$0xff] }
  0x2e   : > { %508 = vadd.xlane.f32.xlu0 %v507_v52  ;;  %505 = vadd.xlane.f32.xlu1 %v504_v60  ;;  %v564_v60 = vsel %vm473_vm0, %v471_v19, 0.0  ;;  %v467_v11 = vmul.f32 %v2799_v1, %v2799_v1  ;;  %v466_v13 = vmul.f32 %v2807_v9, %v2807_v9  ;;  %v463_v34 = vmul.f32 %v399_v30, %v399_v30  ;;  %v395_v36 = vld [vmem:[%s2640_s12 + $0x90] sm:$0xff]  ;;  %v396_v38 = vld [vmem:[%s2640_s12 + $0x98] sm:$0xff] }
  0x2f   : > { %v460_v49 = vmul.f32 %v396_v38, %v396_v38 }
  0x30   : > { %2137 = vmatpush3.bf16.xpose.msra.mxu0 %v666_v45  ;;  %2190 = vmatpush3.bf16.xpose.msra.mxu1 %v666_v45  ;;  %v472_v45 = vmul.f32 %v408_v58, %v408_v58  ;;  %v425_v58 = vld [vmem:[%s2620_s20 + $0x80] sm:$0xff]  ;;  %v540_v42 = vsel %vm473_vm0, %v463_v34, 0.0 }
  0x31   : > { %2202 = vmatprep.subr.msk.bf16.mxu0 %vm473_vm0, %v598_v46  ;;  %2203 = vmatprep.subr.msk.bf16.mxu1 %vm473_vm0, %v598_v46  ;;  %v595_v46 = vpack.c.bf16 %v428_v40, %v427_v39  ;;  %v594_v4 = vpack.c.bf16 %v426_v59, %v425_v58  ;;  %v398_v39 = vld [vmem:[%s2640_s12 + $0xa8] sm:$0xff]  ;;  %v397_v40 = vld [vmem:[%s2640_s12 + $0xa0] sm:$0xff] }
  0x32   : > { %502 = vadd.xlane.f32.xlu0 %v501_v0  ;;  %499 = vadd.xlane.f32.xlu1 %v498_v8  ;;  %v567_v52 = vsel %vm473_vm0, %v472_v45, 0.0  ;;  %v561_v0 = vsel %vm473_vm0, %v470_v53, 0.0  ;;  %v410_v8 = vld [vmem:[%s2620_s20 + $0x8] sm:$0xff]  ;;  %v571_v45 = vpack.c.bf16 %v2744_v16, %v2756_v31  ;;  %v531_v16 = vsel %vm473_vm0, %v460_v49, 0.0  ;;  %s342_s20 = scalar_lea.vmem %s3992_s2, %s4283_s15  ;;  %s3923_s15 = scalar_lea.vmem [#allocation2], %s327_s14 }
  0x33   : > { %v586_v14 = vpack.c.bf16 %v410_v8, %v409_v5  ;;  %v458_v31 = vmul.f32 %v2659_v23, %v2659_v23  ;;  %v581_v23 = vpack.c.bf16 %v400_v18, %v399_v30 }
  0x35   : > { %v651_v29 = vsel %vm473_vm0, %v586_v14, 0  ;;  %v525_v53 = vsel %vm473_vm0, %v458_v31, 0.0 }
  0x36   : > { %496 = vadd.xlane.f32.xlu0 %v495_v10  ;;  %493 = vadd.xlane.f32.xlu1 %v492_v17  ;;  %v558_v10 = vsel %vm473_vm0, %v469_v61, 0.0  ;;  %v401_v17 = vld [vmem:[%s2640_s12 + $0xc0] sm:$0xff] }
  0x37   : > { %v465_v25 = vmul.f32 %v401_v17, %v401_v17 }
  0x38   : > { %2139 = vmatpush3.bf16.xpose.msra.mxu0 %v663_v2  ;;  %2191 = vmatpush3.bf16.xpose.msra.mxu1 %v663_v2  ;;  %v468_v2 = vmul.f32 %v2790_v57, %v2790_v57 }
  0x39   : > { %2204 = vmatprep.subr.msk.bf16.mxu0 %vm473_vm0, %v597_v3  ;;  %2205 = vmatprep.subr.msk.bf16.mxu1 %vm473_vm0, %v597_v3  ;;  %v654_v3 = vsel %vm473_vm0, %v587_v56, 0 }
  0x3a   : > { %490 = vadd.xlane.f32.xlu0 %v489_v24  ;;  %487 = vadd.xlane.f32.xlu1 %v486_v32  ;;  %v555_v12 = vsel %vm473_vm0, %v468_v2, 0.0  ;;  %v552_v24 = vsel %vm473_vm0, %v467_v11, 0.0  ;;  %v546_v32 = vsel %vm473_vm0, %v465_v25, 0.0  ;;  %v891_v25 = vld [vmem:[%s347_s18] sm:$0x3] }
  0x3e   : > { %484 = vadd.xlane.f32.xlu0 %v483_v35  ;;  %481 = vadd.xlane.f32.xlu1 %v480_v41  ;;  %v462_v41 = vmul.f32 %v398_v39, %v398_v39 }
  0x40   : > { %2141 = vmatpush3.bf16.xpose.msra.mxu0 %v660_v27  ;;  %2192 = vmatpush3.bf16.xpose.msra.mxu1 %v660_v27  ;;  %v549_v27 = vsel %vm473_vm0, %v466_v13, 0.0 }
  0x41   : > { %2206 = vmatprep.subr.msk.bf16.mxu0 %vm473_vm0, %v596_v28  ;;  %2207 = vmatprep.subr.msk.bf16.mxu1 %vm473_vm0, %v596_v28  ;;  %v464_v28 = vmul.f32 %v400_v18, %v400_v18 }
  0x42   : > { %478 = vadd.xlane.f32.xlu0 %v477_v43  ;;  %475 = vadd.xlane.f32.xlu1 %v474_v51  ;;  %v461_v43 = vmul.f32 %v397_v40, %v397_v40  ;;  %v459_v51 = vmul.f32 %v395_v36, %v395_v36 }
  0x43   : > { %v543_v35 = vsel %vm473_vm0, %v464_v28, 0.0 }
  0x44   : > { %v534_v50 = vsel %vm473_vm0, %v461_v43, 0.0  ;;  %v528_v19 = vsel %vm473_vm0, %v459_v51, 0.0 }
  0x46   : > { %568 = vadd.xlane.f32.xlu0 %v567_v52  ;;  %565 = vadd.xlane.f32.xlu1 %v564_v60  ;;  %v580_v52 = vpack.c.bf16 %v398_v39, %v397_v40 }
  0x48   : > { %2143 = vmatpush3.bf16.xpose.msra.mxu0 %v657_v20  ;;  %2193 = vmatpush3.bf16.xpose.msra.mxu1 %v657_v20  ;;  %v579_v20 = vpack.c.bf16 %v396_v38, %v395_v36 }
  0x49   : > { %2208 = vmatprep.subr.msk.bf16.mxu0 %vm473_vm0, %v595_v46  ;;  %2209 = vmatprep.subr.msk.bf16.mxu1 %vm473_vm0, %v595_v46  ;;  %v537_v46 = vsel %vm473_vm0, %v462_v41, 0.0 }
  0x4a   : > { %562 = vadd.xlane.f32.xlu0 %v561_v0  ;;  %559 = vadd.xlane.f32.xlu1 %v558_v10 }
  0x4e   : > { %556 = vadd.xlane.f32.xlu0 %v555_v12  ;;  %553 = vadd.xlane.f32.xlu1 %v552_v24  ;;  %v3997_v12 = vlaneseq }
  0x50   : > { %2145 = vmatpush3.bf16.xpose.msra.mxu0 %v654_v3  ;;  %2194 = vmatpush3.bf16.xpose.msra.mxu1 %v654_v3  ;;  %v894_v14 = vshrl.u32 %v3997_v12, 7 }
  0x51   : > { %2210 = vmatprep.subr.msk.bf16.mxu0 %vm473_vm0, %v594_v4  ;;  %2211 = vmatprep.subr.msk.bf16.mxu1 %vm473_vm0, %v594_v4 }
  0x52   : > { %550 = vadd.xlane.f32.xlu0 %v549_v27  ;;  %547 = vadd.xlane.f32.xlu1 %v546_v32  ;;  %v2909_v18 = vsub.s32 0, %v894_v14  ;;  %v2911_v24 = vsub.s32 1, %v894_v14 }
  0x54   : > { %4080 = vst [vmem:[#allocation5_spill] sm:$0xff] %v2909_v18  ;;  %4081 = vst [vmem:[#allocation6_spill] sm:$0xff] %v2911_v24  ;;  %v2919_v30 = vrot.slane %v891_v25, %v2911_v24 }
  0x56   : > { %544 = vadd.xlane.f32.xlu0 %v543_v35  ;;  %541 = vadd.xlane.f32.xlu1 %v540_v42 }
  0x58   : > { %2147 = vmatpush3.bf16.xpose.msra.mxu0 %v651_v29  ;;  %2195 = vmatpush3.bf16.xpose.msra.mxu1 %v651_v29  ;;  %v2916_v29 = vrot.slane %v891_v25, %v2909_v18 }
  0x5a   : > { %538 = vadd.xlane.f32.xlu0 %v537_v46  ;;  %535 = vadd.xlane.f32.xlu1 %v534_v50 }
  0x5e   : > { %532 = vadd.xlane.f32.xlu0 %v531_v16  ;;  %529 = vadd.xlane.f32.xlu1 %v528_v19 }
  0x5f   : > { %2149 = vmatmul.mubr.msk.bf16.vlgmr.msra.gmra.mxu0 %vm473_vm0, %v2653_v21  ;;  %2165 = vmatmul.mubr.msk.bf16.vlgmr.msra.gmra.mxu1 %vm473_vm0, %v2664_v26  ;;  %v457_v21 = vmul.f32 %v2656_v22, %v2656_v22  ;;  %v572_v26 = vpack.c.bf16 %v2728_v7, %v2741_v15  ;;  %v573_v22 = vpack.c.bf16 %v2713_v62, %v2725_v6 }
  0x60   : > { %2150 = vmatprep.mubr.msk.bf16.mxu0 %vm473_vm0, %v571_v45  ;;  %2166 = vmatprep.mubr.msk.bf16.mxu1 %vm473_vm0, %v579_v20  ;;  %v574_v7 = vpack.c.bf16 %v2690_v47, %v2699_v54  ;;  %v582_v15 = vpack.c.bf16 %v2807_v9, %v401_v17  ;;  %v583_v62 = vpack.c.bf16 %v2790_v57, %v2799_v1 }
  0x61   : > { %v522_v56 = vsel %vm473_vm0, %v457_v21, 0.0  ;;  %v584_v47 = vpack.c.bf16 %v2774_v48, %v2785_v55 }
  0x62   : > { %526 = vadd.xlane.f32.xlu0 %v525_v53  ;;  %523 = vadd.xlane.f32.xlu1 %v522_v56 }
  0x67   : > { %2151 = vmatmul.mubr.msk.bf16.gmra.mxu0 %vm473_vm0, %v571_v45  ;;  %2167 = vmatmul.mubr.msk.bf16.gmra.mxu1 %vm473_vm0, %v579_v20 }
  0x68   : > { %2152 = vmatprep.mubr.msk.bf16.mxu0 %vm473_vm0, %v572_v26  ;;  %2168 = vmatprep.mubr.msk.bf16.mxu1 %vm473_vm0, %v580_v52 }
  0x6f   : > { %2153 = vmatmul.mubr.msk.bf16.gmra.mxu0 %vm473_vm0, %v572_v26  ;;  %2169 = vmatmul.mubr.msk.bf16.gmra.mxu1 %vm473_vm0, %v580_v52 }
  0x70   : > { %2154 = vmatprep.mubr.msk.bf16.mxu0 %vm473_vm0, %v573_v22  ;;  %2170 = vmatprep.mubr.msk.bf16.mxu1 %vm473_vm0, %v581_v23 }
  0x77   : > { %2155 = vmatmul.mubr.msk.bf16.gmra.mxu0 %vm473_vm0, %v573_v22  ;;  %2171 = vmatmul.mubr.msk.bf16.gmra.mxu1 %vm473_vm0, %v581_v23 }
  0x78   : > { %2156 = vmatprep.mubr.msk.bf16.mxu0 %vm473_vm0, %v574_v7  ;;  %2172 = vmatprep.mubr.msk.bf16.mxu1 %vm473_vm0, %v582_v15 }
  0x7f   : > { %2157 = vmatmul.mubr.msk.bf16.gmra.mxu0 %vm473_vm0, %v574_v7  ;;  %2173 = vmatmul.mubr.msk.bf16.gmra.mxu1 %vm473_vm0, %v582_v15 }
  0x80   : > { %2158 = vmatprep.mubr.msk.bf16.mxu0 %vm473_vm0, %v2686_v44  ;;  %2174 = vmatprep.mubr.msk.bf16.mxu1 %vm473_vm0, %v583_v62 }
  0x87   : > { %2159 = vmatmul.mubr.msk.bf16.gmra.mxu0 %vm473_vm0, %v2686_v44  ;;  %2175 = vmatmul.mubr.msk.bf16.gmra.mxu1 %vm473_vm0, %v583_v62 }
  0x88   : > { %2160 = vmatprep.mubr.msk.bf16.mxu0 %vm473_vm0, %v2680_v37  ;;  %2176 = vmatprep.mubr.msk.bf16.mxu1 %vm473_vm0, %v584_v47 }
  0x8f   : > { %2161 = vmatmul.mubr.msk.bf16.gmra.mxu0 %vm473_vm0, %v2680_v37  ;;  %2177 = vmatmul.mubr.msk.bf16.gmra.mxu1 %vm473_vm0, %v584_v47 }
  0x90   : > { %2162 = vmatprep.mubr.msk.bf16.mxu0 %vm473_vm0, %v2671_v33  ;;  %2178 = vmatprep.mubr.msk.bf16.mxu1 %vm473_vm0, %v2716_v63 }
  0x97   : > { %2163 = vmatmul.mubr.msk.bf16.gmra.mxu0 %vm473_vm0, %v2671_v33  ;;  %2179 = vmatmul.mubr.msk.bf16.gmra.mxu1 %vm473_vm0, %v2716_v63 }
  0xad   : > { %v521_v54 = vpop.xlane.xlu0 %520 }
  0xae   : > { %v515_v44 = vpop.xlane.xlu1 %514  ;;  %v2922_v32 = vadd.f32 %v2916_v29, %v521_v54  ;;  %v2925_v34 = vadd.f32 %v2919_v30, %v521_v54 }
  0xaf   : > { %v2928_v35 = vadd.f32 %v2916_v29, %v515_v44  ;;  %v2931_v36 = vadd.f32 %v2919_v30, %v515_v44 }
  0xb0   : > { %4082 = vst [vmem:[#allocation7_spill] sm:$0xff] %v2922_v32  ;;  %4083 = vst [vmem:[#allocation8_spill] sm:$0xff] %v2925_v34 }
  0xb1   : > { %4084 = vst [vmem:[#allocation9_spill] sm:$0xff] %v2928_v35  ;;  %4085 = vst [vmem:[#allocation10_spill] sm:$0xff] %v2931_v36 }
  0xb3   : > { %v512_v6 = vpop.xlane.xlu1 %511  ;;  %v518_v48 = vpop.xlane.xlu0 %517 }
  0xb4   : > { %v2934_v38 = vadd.f32 %v2916_v29, %v518_v48  ;;  %v2937_v39 = vadd.f32 %v2919_v30, %v518_v48  ;;  %v2940_v40 = vadd.f32 %v2916_v29, %v512_v6  ;;  %v2943_v41 = vadd.f32 %v2919_v30, %v512_v6 }
  0xb6   : > { %4086 = vst [vmem:[#allocation11_spill] sm:$0xff] %v2934_v38  ;;  %4087 = vst [vmem:[#allocation12_spill] sm:$0xff] %v2937_v39 }
  0xb7   : > { %v506_v55 = vpop.xlane.xlu1 %505  ;;  %v509_v37 = vpop.xlane.xlu0 %508  ;;  %4088 = vst [vmem:[#allocation13_spill] sm:$0xff] %v2940_v40  ;;  %4089 = vst [vmem:[#allocation14_spill] sm:$0xff] %v2943_v41 }
  0xb8   : > { %v2946_v43 = vadd.f32 %v2916_v29, %v509_v37  ;;  %v2949_v45 = vadd.f32 %v2919_v30, %v509_v37  ;;  %v2952_v20 = vadd.f32 %v2916_v29, %v506_v55  ;;  %v2955_v46 = vadd.f32 %v2919_v30, %v506_v55 }
  0xbb   : > { %v500_v57 = vpop.xlane.xlu1 %499  ;;  %v503_v58 = vpop.xlane.xlu0 %502 }
  0xbc   : > { %v2960_v50 = vadd.f32 %v2916_v29, %v503_v58  ;;  %v2963_v51 = vadd.f32 %v2919_v30, %v503_v58  ;;  %v2966_v16 = vadd.f32 %v2916_v29, %v500_v57  ;;  %v2969_v31 = vadd.f32 %v2919_v30, %v500_v57 }
  0xbf   : > { %v494_v59 = vpop.xlane.xlu1 %493  ;;  %v497_v60 = vpop.xlane.xlu0 %496 }
  0xc0   : > { %v2972_v19 = vadd.f32 %v2916_v29, %v497_v60  ;;  %v2975_v21 = vadd.f32 %v2919_v30, %v497_v60  ;;  %v2978_v26 = vadd.f32 %v2916_v29, %v494_v59  ;;  %v2981_v52 = vadd.f32 %v2919_v30, %v494_v59 }
  0xc3   : > { %v488_v61 = vpop.xlane.xlu1 %487  ;;  %v491_v0 = vpop.xlane.xlu0 %490 }
  0xc4   : > { %v2984_v53 = vadd.f32 %v2916_v29, %v491_v0  ;;  %v2987_v56 = vadd.f32 %v2919_v30, %v491_v0  ;;  %v2990_v22 = vadd.f32 %v2916_v29, %v488_v61  ;;  %v2993_v23 = vadd.f32 %v2919_v30, %v488_v61 }
  0xc7   : > { %v482_v1 = vpop.xlane.xlu1 %481  ;;  %v485_v2 = vpop.xlane.xlu0 %484 }
  0xc8   : > { %v2996_v7 = vadd.f32 %v2916_v29, %v485_v2  ;;  %v2999_v15 = vadd.f32 %v2919_v30, %v485_v2  ;;  %v3002_v62 = vadd.f32 %v2916_v29, %v482_v1  ;;  %v3005_v47 = vadd.f32 %v2919_v30, %v482_v1 }
  0xcb   : > { %v476_v3 = vpop.xlane.xlu1 %475  ;;  %v479_v33 = vpop.xlane.xlu0 %478 }
  0xcc   : > { %v3008_v44 = vadd.f32 %v2916_v29, %v479_v33  ;;  %v3011_v54 = vadd.f32 %v2919_v30, %v479_v33  ;;  %v903_v6 = vadd.f32 %v2916_v29, %v476_v3  ;;  %v904_v48 = vadd.f32 %v2919_v30, %v476_v3 }
  0xcf   : > { %v566_v4 = vpop.xlane.xlu1 %565  ;;  %v569_v5 = vpop.xlane.xlu0 %568 }
  0xd0   : > { %v3016_v37 = vadd.f32 %v2916_v29, %v569_v5  ;;  %v3019_v57 = vadd.f32 %v2919_v30, %v569_v5  ;;  %v3022_v58 = vadd.f32 %v2916_v29, %v566_v4  ;;  %v3025_v59 = vadd.f32 %v2919_v30, %v566_v4 }
  0xd2   : > { %4090 = vst [vmem:[#allocation15_spill] sm:$0xff] %v3016_v37  ;;  %4091 = vst [vmem:[#allocation16_spill] sm:$0xff] %v3019_v57 }
  0xd3   : > { %v2893_v63 = vpop.xlane.xlu1 %559  ;;  %v563_v8 = vpop.xlane.xlu0 %562  ;;  %4092 = vst [vmem:[#allocation17_spill] sm:$0xff] %v3022_v58  ;;  %4093 = vst [vmem:[#allocation18_spill] sm:$0xff] %v3025_v59 }
  0xd4   : > { %v3028_v61 = vadd.f32 %v2916_v29, %v563_v8  ;;  %v3031_v0 = vadd.f32 %v2919_v30, %v563_v8  ;;  %v3035_v1 = vadd.f32 %v2916_v29, %v2893_v63  ;;  %v3039_v2 = vadd.f32 %v2919_v30, %v2893_v63 }
  0xd6   : > { %4094 = vst [vmem:[#allocation19_spill] sm:$0xff] %v3028_v61  ;;  %4095 = vst [vmem:[#allocation20_spill] sm:$0xff] %v3031_v0 }
  0xd7   : > { %v2895_v9 = vpop.xlane.xlu1 %553  ;;  %v557_v10 = vpop.xlane.xlu0 %556  ;;  %4096 = vst [vmem:[#allocation21_spill] sm:$0xff] %v3035_v1  ;;  %4097 = vst [vmem:[#allocation22_spill] sm:$0xff] %v3039_v2 }
  0xd8   : > { %v3042_v3 = vadd.f32 %v2916_v29, %v557_v10  ;;  %v3045_v33 = vadd.f32 %v2919_v30, %v557_v10  ;;  %v3049_v4 = vadd.f32 %v2916_v29, %v2895_v9  ;;  %v3053_v5 = vadd.f32 %v2919_v30, %v2895_v9 }
  0xda   : > { %4098 = vst [vmem:[#allocation23_spill] sm:$0xff] %v3045_v33 }
  0xdb   : > { %v2898_v11 = vpop.xlane.xlu1 %547  ;;  %v551_v13 = vpop.xlane.xlu0 %550 }
  0xdc   : > { %v3056_v8 = vadd.f32 %v2916_v29, %v551_v13  ;;  %v3059_v63 = vadd.f32 %v2919_v30, %v551_v13  ;;  %v3063_v14 = vadd.f32 %v2916_v29, %v2898_v11  ;;  %v3068_v12 = vadd.f32 %v2919_v30, %v2898_v11 }
  0xdf   : > { %v2903_v17 = vpop.xlane.xlu1 %541  ;;  %v545_v27 = vpop.xlane.xlu0 %544 }
  0xe0   : > { %v3071_v9 = vadd.f32 %v2916_v29, %v545_v27  ;;  %v3074_v18 = vadd.f32 %v2919_v30, %v545_v27  ;;  %v3078_v13 = vadd.f32 %v2916_v29, %v2903_v17  ;;  %v3082_v34 = vadd.f32 %v2919_v30, %v2903_v17 }
  0xe3   : > { %v2913_v28 = vpop.xlane.xlu1 %535  ;;  %v539_v42 = vpop.xlane.xlu0 %538 }
  0xe4   : > { %v3085_v37 = vadd.f32 %v2916_v29, %v539_v42  ;;  %v3088_v39 = vadd.f32 %v2919_v30, %v539_v42  ;;  %v3092_v27 = vadd.f32 %v2916_v29, %v2913_v28 }
  0xe7   : > { %v2957_v49 = vpop.xlane.xlu1 %529  ;;  %v533_v55 = vpop.xlane.xlu0 %532 }
  0xe8   : > { %v3100_v35 = vadd.f32 %v2916_v29, %v533_v55  ;;  %v3103_v42 = vadd.f32 %v2919_v30, %v533_v55  ;;  %v939_v2 = vadd.f32 %v2916_v29, %v2957_v49 }
  0xeb   : > { %v524_v60 = vpop.xlane.xlu1 %523  ;;  %v527_v32 = vpop.xlane.xlu0 %526 }
  0xec   : > { %v935_v10 = vadd.f32 %v2916_v29, %v524_v60  ;;  %v936_v17 = vadd.f32 %v2919_v30, %v524_v60 }
 0x11f   : > { %v732_v25 = vpop.f32.mrf.mxu0  ;;  %v812_v24 = vpop.f32.mrf.mxu1 }
 0x120   : > { %v967_v57 = vmul.f32 2.0, %v732_v25  ;;  %v999_v11 = vmul.f32 2.0, %v812_v24  ;;  %v3096_v25 = vadd.f32 %v2919_v30, %v2913_v28  ;;  %v937_v28 = vadd.f32 %v2916_v29, %v527_v32 }
 0x121   : > { %v734_v59 = vpop.f32.mrf.mxu0  ;;  %v814_v58 = vpop.f32.mrf.mxu1 }
 0x122   : > { %v1031_v38 = vsub.f32 %v903_v6, %v967_v57  ;;  %v968_v0 = vmul.f32 2.0, %v734_v59  ;;  %v1000_v36 = vmul.f32 2.0, %v814_v58  ;;  %v1063_v24 = vsub.f32 %v935_v10, %v999_v11 }
 0x123   : > { %v736_v61 = vpop.f32.mrf.mxu0  ;;  %v816_v41 = vpop.f32.mrf.mxu1  ;;  %v940_v59 = vadd.f32 %v2919_v30, %v2957_v49  ;;  %v938_v11 = vadd.f32 %v2919_v30, %v527_v32 }
 0x124   : > { %v3108_v1 = vmax.f32 %v1031_v38, 0.0  ;;  %v1032_v60 = vsub.f32 %v904_v48, %v968_v0  ;;  %v969_v6 = vmul.f32 2.0, %v736_v61  ;;  %v1001_v57 = vmul.f32 2.0, %v816_v41 }
 0x125   : > { %v738_v58 = vpop.f32.mrf.mxu0  ;;  %v818_v10 = vpop.f32.mrf.mxu1  ;;  %v1064_v55 = vsub.f32 %v936_v17, %v1000_v36  ;;  %v3113_v40 = vmax.f32 %v1063_v24, 0.0 }
 0x126   : > { %4099 = vst [vmem:[#allocation24_spill] sm:$0xff] %v3108_v1  ;;  %2285 = vrsqrt.f32 %v3108_v1  ;;  %v3116_v33 = vmax.f32 %v1032_v60, 0.0  ;;  %v1033_v29 = vsub.f32 %v3008_v44, %v969_v6  ;;  %v970_v38 = vmul.f32 2.0, %v738_v58 }
 0x127   : > { %4100 = vst [vmem:[#allocation25_spill] sm:$0xff] %v3113_v40  ;;  %v742_v48 = vpop.f32.mrf.mxu0  ;;  %v1002_v61 = vmul.f32 2.0, %v818_v10  ;;  %v1065_v41 = vsub.f32 %v937_v28, %v1001_v57  ;;  %v3119_v0 = vmax.f32 %v1064_v55, 0.0  ;;  %2287 = vrsqrt.f32 %v3113_v40  ;;  %v822_v49 = vpop.f32.mrf.mxu1 }
 0x128   : > { %4101 = vst [vmem:[#allocation26_spill] sm:$0xff] %v3116_v33  ;;  %2289 = vrsqrt.f32 %v3116_v33  ;;  %v3123_v30 = vmax.f32 %v1033_v29, 0.0  ;;  %v1034_v32 = vsub.f32 %v3011_v54, %v970_v38  ;;  %v971_v36 = vmul.f32 2.0, %v742_v48 }
 0x129   : > { %4102 = vst [vmem:[#allocation27_spill] sm:$0xff] %v3119_v0  ;;  %v744_v17 = vpop.f32.mrf.mxu0  ;;  %v1066_v24 = vsub.f32 %v938_v11, %v1002_v61  ;;  %v3126_v60 = vmax.f32 %v1065_v41, 0.0  ;;  %2291 = vrsqrt.f32 %v3119_v0  ;;  %v1003_v44 = vmul.f32 2.0, %v822_v49  ;;  %v824_v28 = vpop.f32.mrf.mxu1 }
 0x12a   : > { %4103 = vst [vmem:[#allocation28_spill] sm:$0xff] %v3123_v30  ;;  %2293 = vrsqrt.f32 %v3123_v30  ;;  %v3130_v6 = vmax.f32 %v1034_v32, 0.0  ;;  %v1035_v57 = vsub.f32 %v3002_v62, %v971_v36  ;;  %v972_v58 = vmul.f32 2.0, %v744_v17 }
 0x12b   : > { %4104 = vst [vmem:[#allocation29_spill] sm:$0xff] %v3126_v60  ;;  %v746_v10 = vpop.f32.mrf.mxu0  ;;  %v3133_v55 = vmax.f32 %v1066_v24, 0.0  ;;  %2295 = vrsqrt.f32 %v3126_v60  ;;  %v1067_v54 = vsub.f32 %v939_v2, %v1003_v44  ;;  %v1004_v11 = vmul.f32 2.0, %v824_v28  ;;  %v826_v29 = vpop.f32.mrf.mxu1 }
 0x12c   : > { %4105 = vst [vmem:[#allocation30_spill] sm:$0xff] %v3130_v6  ;;  %2297 = vrsqrt.f32 %v3130_v6  ;;  %v3137_v38 = vmax.f32 %v1035_v57, 0.0  ;;  %v1036_v48 = vsub.f32 %v3005_v47, %v972_v58  ;;  %v973_v61 = vmul.f32 2.0, %v746_v10 }
 0x12d   : > { %4106 = vst [vmem:[#allocation31_spill] sm:$0xff] %v3133_v55  ;;  %v748_v41 = vpop.f32.mrf.mxu0  ;;  %2299 = vrsqrt.f32 %v3133_v55  ;;  %v3141_v62 = vmax.f32 %v1067_v54, 0.0  ;;  %v1068_v49 = vsub.f32 %v940_v59, %v1004_v11  ;;  %v1005_v32 = vmul.f32 2.0, %v826_v29  ;;  %v828_v36 = vpop.f32.mrf.mxu1 }
 0x12e   : > { %4107 = vst [vmem:[#allocation32_spill] sm:$0xff] %v3137_v38  ;;  %2301 = vrsqrt.f32 %v3137_v38  ;;  %v3144_v2 = vmax.f32 %v1036_v48, 0.0  ;;  %v1037_v17 = vsub.f32 %v2996_v7, %v973_v61  ;;  %v974_v24 = vmul.f32 2.0, %v748_v41 }
 0x12f   : > { %4108 = vst [vmem:[#allocation33_spill] sm:$0xff] %v3141_v62  ;;  %v752_v44 = vpop.f32.mrf.mxu0  ;;  %2303 = vrsqrt.f32 %v3141_v62  ;;  %v3148_v47 = vmax.f32 %v1068_v49, 0.0  ;;  %v1069_v28 = vsub.f32 %v3100_v35, %v1005_v32  ;;  %v1006_v57 = vmul.f32 2.0, %v828_v36  ;;  %v832_v58 = vpop.f32.mrf.mxu1 }
 0x130   : > { %2305 = vrsqrt.f32 %v3144_v2  ;;  %v3152_v59 = vmax.f32 %v1037_v17, 0.0  ;;  %v1038_v10 = vsub.f32 %v2999_v15, %v974_v24  ;;  %v975_v54 = vmul.f32 2.0, %v752_v44 }
 0x131   : > { %4109 = vst [vmem:[#allocation34_spill] sm:$0xff] %v3148_v47  ;;  %v754_v11 = vpop.f32.mrf.mxu0  ;;  %2307 = vrsqrt.f32 %v3148_v47  ;;  %v3156_v7 = vmax.f32 %v1069_v28, 0.0  ;;  %v1070_v29 = vsub.f32 %v3103_v42, %v1006_v57  ;;  %v1007_v48 = vmul.f32 2.0, %v832_v58  ;;  %v834_v61 = vpop.f32.mrf.mxu1 }
 0x132   : > { %2309 = vrsqrt.f32 %v3152_v59  ;;  %v3160_v35 = vmax.f32 %v1038_v10, 0.0  ;;  %v1039_v41 = vsub.f32 %v2990_v22, %v975_v54  ;;  %v976_v49 = vmul.f32 2.0, %v754_v11 }
 0x133   : > { %4110 = vst [vmem:[#allocation35_spill] sm:$0xff] %v3156_v7  ;;  %v3163_v32 = vpop.eup %2285  ;;  %v756_v15 = vpop.f32.mrf.mxu0  ;;  %2311 = vrsqrt.f32 %v3156_v7  ;;  %v3166_v36 = vmax.f32 %v1070_v29, 0.0  ;;  %v1071_v17 = vsub.f32 %v3092_v27, %v1007_v48  ;;  %v1008_v24 = vmul.f32 2.0, %v834_v61 }
 0x134   : > { %4111 = vst [vmem:[#allocation36_spill] sm:$0xff] %v3163_v32  ;;  %v836_v42 = vpop.f32.mrf.mxu1  ;;  %v3169_v44 = vpop.eup %2287  ;;  %2313 = vrsqrt.f32 %v3160_v35  ;;  %v3172_v28 = vmax.f32 %v1039_v41, 0.0  ;;  %v1040_v22 = vsub.f32 %v2993_v23, %v976_v49  ;;  %v977_v57 = vmul.f32 2.0, %v756_v15 }
 0x135   : > { %4112 = vst [vmem:[#allocation37_spill] sm:$0xff] %v3166_v36  ;;  %4113 = vst [vmem:[#allocation38_spill] sm:$0xff] %v3169_v44  ;;  %v3175_v58 = vpop.eup %2289  ;;  %v758_v10 = vpop.f32.mrf.mxu0  ;;  %2315 = vrsqrt.f32 %v3166_v36  ;;  %v3178_v54 = vmax.f32 %v1071_v17, 0.0  ;;  %v1072_v27 = vsub.f32 %v3096_v25, %v1008_v24  ;;  %v1009_v11 = vmul.f32 2.0, %v836_v42 }
 0x136   : > { %4114 = vst [vmem:[#allocation39_spill] sm:$0xff] %v3175_v58  ;;  %v838_v29 = vpop.f32.mrf.mxu1  ;;  %v3181_v48 = vpop.eup %2291  ;;  %2317 = vrsqrt.f32 %v3172_v28  ;;  %v3184_v61 = vmax.f32 %v1040_v22, 0.0  ;;  %v1041_v23 = vsub.f32 %v2984_v53, %v977_v57  ;;  %v978_v41 = vmul.f32 2.0, %v758_v10 }
 0x137   : > { %4115 = vst [vmem:[#allocation40_spill] sm:$0xff] %v3178_v54  ;;  %4116 = vst [vmem:[#allocation41_spill] sm:$0xff] %v3181_v48  ;;  %v3187_v49 = vpop.eup %2293  ;;  %v762_v15 = vpop.f32.mrf.mxu0  ;;  %2319 = vrsqrt.f32 %v3178_v54  ;;  %v3190_v17 = vmax.f32 %v1072_v27, 0.0  ;;  %v1073_v25 = vsub.f32 %v3085_v37, %v1009_v11  ;;  %v1010_v24 = vmul.f32 2.0, %v838_v29 }
 0x138   : > { %4117 = vst [vmem:[#allocation42_spill] sm:$0xff] %v3187_v49  ;;  %v842_v42 = vpop.f32.mrf.mxu1  ;;  %v3193_v44 = vpop.eup %2295  ;;  %2321 = vrsqrt.f32 %v3184_v61  ;;  %v3196_v22 = vmax.f32 %v1041_v23, 0.0  ;;  %v1042_v53 = vsub.f32 %v2987_v56, %v978_v41  ;;  %v979_v57 = vmul.f32 2.0, %v762_v15 }
 0x139   : > { %4118 = vst [vmem:[#allocation43_spill] sm:$0xff] %v3190_v17  ;;  %4119 = vst [vmem:[#allocation44_spill] sm:$0xff] %v3193_v44  ;;  %v3199_v10 = vpop.eup %2297  ;;  %v764_v40 = vpop.f32.mrf.mxu0  ;;  %2323 = vrsqrt.f32 %v3190_v17  ;;  %v3202_v27 = vmax.f32 %v1073_v25, 0.0  ;;  %v1074_v37 = vsub.f32 %v3088_v39, %v1010_v24  ;;  %v1011_v11 = vmul.f32 2.0, %v842_v42 }
 0x13a   : > { %4120 = vst [vmem:[#allocation45_spill] sm:$0xff] %v3199_v10  ;;  %v844_v29 = vpop.f32.mrf.mxu1  ;;  %v3205_v48 = vpop.eup %2299  ;;  %2325 = vrsqrt.f32 %v3196_v22  ;;  %v3208_v23 = vmax.f32 %v1042_v53, 0.0  ;;  %v1043_v56 = vsub.f32 %v2978_v26, %v979_v57  ;;  %v980_v41 = vmul.f32 2.0, %v764_v40 }
 0x13b   : > { %4121 = vst [vmem:[#allocation46_spill] sm:$0xff] %v3202_v27  ;;  %4122 = vst [vmem:[#allocation47_spill] sm:$0xff] %v3205_v48  ;;  %v3211_v15 = vpop.eup %2301  ;;  %v766_v0 = vpop.f32.mrf.mxu0  ;;  %2327 = vrsqrt.f32 %v3202_v27  ;;  %v3214_v25 = vmax.f32 %v1074_v37, 0.0  ;;  %v1075_v39 = vsub.f32 %v3078_v13, %v1011_v11  ;;  %v1012_v24 = vmul.f32 2.0, %v844_v29 }
 0x13c   : > { %4123 = vst [vmem:[#allocation48_spill] sm:$0xff] %v3211_v15  ;;  %v846_v42 = vpop.f32.mrf.mxu1  ;;  %v3217_v44 = vpop.eup %2303  ;;  %2329 = vrsqrt.f32 %v3208_v23  ;;  %v3220_v53 = vmax.f32 %v1043_v56, 0.0  ;;  %v1044_v26 = vsub.f32 %v2981_v52, %v980_v41  ;;  %v981_v40 = vmul.f32 2.0, %v766_v0 }
 0x13d   : > { %4124 = vst [vmem:[#allocation49_spill] sm:$0xff] %v3214_v25  ;;  %4125 = vst [vmem:[#allocation50_spill] sm:$0xff] %v3217_v44  ;;  %v3223_v57 = vpop.eup %2305  ;;  %v768_v60 = vpop.f32.mrf.mxu0  ;;  %2331 = vrsqrt.f32 %v3214_v25  ;;  %v3226_v37 = vmax.f32 %v1075_v39, 0.0  ;;  %v1076_v13 = vsub.f32 %v3082_v34, %v1012_v24  ;;  %v1013_v11 = vmul.f32 2.0, %v846_v42 }
 0x13e   : > { %v848_v29 = vpop.f32.mrf.mxu1  ;;  %v3229_v48 = vpop.eup %2307  ;;  %2333 = vrsqrt.f32 %v3220_v53  ;;  %v3232_v56 = vmax.f32 %v1044_v26, 0.0  ;;  %v1045_v52 = vsub.f32 %v2972_v19, %v981_v40  ;;  %v982_v0 = vmul.f32 2.0, %v768_v60 }
 0x13f   : > { %4126 = vst [vmem:[#allocation51_spill] sm:$0xff] %v3226_v37  ;;  %4127 = vst [vmem:[#allocation52_spill] sm:$0xff] %v3229_v48  ;;  %v3235_v41 = vpop.eup %2309  ;;  %v772_v55 = vpop.f32.mrf.mxu0  ;;  %2335 = vrsqrt.f32 %v3226_v37  ;;  %v3238_v39 = vmax.f32 %v1076_v13, 0.0  ;;  %v1077_v34 = vsub.f32 %v3071_v9, %v1013_v11  ;;  %v1014_v24 = vmul.f32 2.0, %v848_v29 }
 0x140   : > { %v852_v42 = vpop.f32.mrf.mxu1  ;;  %v3241_v44 = vpop.eup %2311  ;;  %2337 = vrsqrt.f32 %v3232_v56  ;;  %v3244_v26 = vmax.f32 %v1045_v52, 0.0  ;;  %v1046_v19 = vsub.f32 %v2975_v21, %v982_v0  ;;  %v983_v60 = vmul.f32 2.0, %v772_v55 }
 0x141   : > { %4128 = vst [vmem:[#allocation53_spill] sm:$0xff] %v3238_v39  ;;  %4129 = vst [vmem:[#allocation54_spill] sm:$0xff] %v3241_v44  ;;  %v3247_v40 = vpop.eup %2313  ;;  %v774_v62 = vpop.f32.mrf.mxu0  ;;  %2339 = vrsqrt.f32 %v3238_v39  ;;  %v3250_v13 = vmax.f32 %v1077_v34, 0.0  ;;  %v1078_v9 = vsub.f32 %v3074_v18, %v1014_v24  ;;  %v1015_v11 = vmul.f32 2.0, %v852_v42 }
 0x142   : > { %v854_v29 = vpop.f32.mrf.mxu1  ;;  %v3253_v48 = vpop.eup %2315  ;;  %2341 = vrsqrt.f32 %v3244_v26  ;;  %v3256_v52 = vmax.f32 %v1046_v19, 0.0  ;;  %v1047_v21 = vsub.f32 %v2966_v16, %v983_v60  ;;  %v984_v55 = vmul.f32 2.0, %v774_v62 }
 0x143   : > { %4130 = vst [vmem:[#allocation55_spill] sm:$0xff] %v3250_v13  ;;  %4131 = vst [vmem:[#allocation56_spill] sm:$0xff] %v3253_v48  ;;  %v3259_v0 = vpop.eup %2317  ;;  %v776_v47 = vpop.f32.mrf.mxu0  ;;  %2343 = vrsqrt.f32 %v3250_v13  ;;  %v3262_v34 = vmax.f32 %v1078_v9, 0.0  ;;  %v1079_v18 = vsub.f32 %v3063_v14, %v1015_v11  ;;  %v1016_v24 = vmul.f32 2.0, %v854_v29 }
 0x144   : > { %v856_v42 = vpop.f32.mrf.mxu1  ;;  %v3265_v44 = vpop.eup %2319  ;;  %2345 = vrsqrt.f32 %v3256_v52  ;;  %v3268_v19 = vmax.f32 %v1047_v21, 0.0  ;;  %v1048_v16 = vsub.f32 %v2969_v31, %v984_v55  ;;  %v985_v62 = vmul.f32 2.0, %v776_v47 }
 0x145   : > { %4132 = vst [vmem:[#allocation57_spill] sm:$0xff] %v3262_v34  ;;  %4133 = vst [vmem:[#allocation58_spill] sm:$0xff] %v3265_v44  ;;  %v3271_v60 = vpop.eup %2321  ;;  %v778_v7 = vpop.f32.mrf.mxu0  ;;  %2347 = vrsqrt.f32 %v3262_v34  ;;  %v3274_v9 = vmax.f32 %v1079_v18, 0.0  ;;  %v1080_v14 = vsub.f32 %v3068_v12, %v1016_v24  ;;  %v1017_v11 = vmul.f32 2.0, %v856_v42  ;;  %v4151_v34 = vld [vmem:[#allocation21_spill] sm:$0xff] }
 0x146   : > { %v858_v29 = vpop.f32.mrf.mxu1  ;;  %v3277_v48 = vpop.eup %2323  ;;  %2349 = vrsqrt.f32 %v3268_v19  ;;  %v3280_v21 = vmax.f32 %v1048_v16, 0.0  ;;  %v1049_v31 = vsub.f32 %v2960_v50, %v985_v62  ;;  %v986_v47 = vmul.f32 2.0, %v778_v7 }
 0x147   : > { %4134 = vst [vmem:[#allocation59_spill] sm:$0xff] %v3274_v9  ;;  %4135 = vst [vmem:[#allocation60_spill] sm:$0xff] %v3277_v48  ;;  %v3283_v55 = vpop.eup %2325  ;;  %v782_v36 = vpop.f32.mrf.mxu0  ;;  %2351 = vrsqrt.f32 %v3274_v9  ;;  %v3286_v18 = vmax.f32 %v1080_v14, 0.0  ;;  %v1081_v12 = vsub.f32 %v3056_v8, %v1017_v11  ;;  %v1018_v24 = vmul.f32 2.0, %v858_v29 }
 0x148   : > { %v862_v42 = vpop.f32.mrf.mxu1  ;;  %v3289_v44 = vpop.eup %2327  ;;  %2353 = vrsqrt.f32 %v3280_v21  ;;  %v3292_v16 = vmax.f32 %v1049_v31, 0.0  ;;  %v1050_v50 = vsub.f32 %v2963_v51, %v986_v47  ;;  %v987_v7 = vmul.f32 2.0, %v782_v36 }
 0x149   : > { %4136 = vst [vmem:[#allocation61_spill] sm:$0xff] %v3286_v18  ;;  %4137 = vst [vmem:[#allocation62_spill] sm:$0xff] %v3289_v44  ;;  %v3295_v62 = vpop.eup %2329  ;;  %v784_v54 = vpop.f32.mrf.mxu0  ;;  %2355 = vrsqrt.f32 %v3286_v18  ;;  %v3298_v14 = vmax.f32 %v1081_v12, 0.0  ;;  %v1082_v8 = vsub.f32 %v3059_v63, %v1018_v24  ;;  %v1019_v11 = vmul.f32 2.0, %v862_v42 }
 0x14a   : > { %v864_v29 = vpop.f32.mrf.mxu1  ;;  %v3301_v48 = vpop.eup %2331  ;;  %2357 = vrsqrt.f32 %v3292_v16  ;;  %v3304_v31 = vmax.f32 %v1050_v50, 0.0  ;;  %v1051_v51 = vsub.f32 %v2952_v20, %v987_v7  ;;  %v988_v36 = vmul.f32 2.0, %v784_v54 }
 0x14b   : > { %4138 = vst [vmem:[#allocation63_spill] sm:$0xff] %v3298_v14  ;;  %4139 = vst [vmem:[#allocation64_spill] sm:$0xff] %v3301_v48  ;;  %v3307_v47 = vpop.eup %2333  ;;  %v786_v17 = vpop.f32.mrf.mxu0  ;;  %2359 = vrsqrt.f32 %v3298_v14  ;;  %v3310_v12 = vmax.f32 %v1082_v8, 0.0  ;;  %v1083_v63 = vsub.f32 %v3049_v4, %v1019_v11  ;;  %v1020_v24 = vmul.f32 2.0, %v864_v29  ;;  %v4155_v14 = vld [vmem:[#allocation22_spill] sm:$0xff] }
 0x14c   : > { %v866_v42 = vpop.f32.mrf.mxu1  ;;  %v3313_v44 = vpop.eup %2335  ;;  %2361 = vrsqrt.f32 %v3304_v31  ;;  %v3316_v50 = vmax.f32 %v1051_v51, 0.0  ;;  %v1052_v20 = vsub.f32 %v2955_v46, %v988_v36  ;;  %v989_v54 = vmul.f32 2.0, %v786_v17 }
 0x14d   : > { %4140 = vst [vmem:[#allocation65_spill] sm:$0xff] %v3310_v12  ;;  %4141 = vst [vmem:[#allocation66_spill] sm:$0xff] %v3313_v44  ;;  %v3319_v7 = vpop.eup %2337  ;;  %v788_v27 = vpop.f32.mrf.mxu0  ;;  %2363 = vrsqrt.f32 %v3310_v12  ;;  %v3322_v8 = vmax.f32 %v1083_v63, 0.0  ;;  %v1084_v4 = vsub.f32 %v3053_v5, %v1020_v24  ;;  %v1021_v11 = vmul.f32 2.0, %v866_v42 }
 0x14e   : > { %v868_v29 = vpop.f32.mrf.mxu1  ;;  %v3325_v48 = vpop.eup %2339  ;;  %2365 = vrsqrt.f32 %v3316_v50  ;;  %v3328_v51 = vmax.f32 %v1052_v20, 0.0  ;;  %v1053_v46 = vsub.f32 %v2946_v43, %v989_v54  ;;  %v990_v17 = vmul.f32 2.0, %v788_v27 }
 0x14f   : > { %4142 = vst [vmem:[#allocation67_spill] sm:$0xff] %v3322_v8  ;;  %4143 = vst [vmem:[#allocation68_spill] sm:$0xff] %v3325_v48  ;;  %v3331_v36 = vpop.eup %2341  ;;  %v792_v25 = vpop.f32.mrf.mxu0  ;;  %2367 = vrsqrt.f32 %v3322_v8  ;;  %v3334_v63 = vmax.f32 %v1084_v4, 0.0  ;;  %v1085_v5 = vsub.f32 %v3042_v3, %v1021_v11  ;;  %v1022_v24 = vmul.f32 2.0, %v868_v29  ;;  %v4147_v48 = vld [vmem:[#allocation23_spill] sm:$0xff] }
 0x150   : > { %v872_v42 = vpop.f32.mrf.mxu1  ;;  %v3337_v44 = vpop.eup %2343  ;;  %2369 = vrsqrt.f32 %v3328_v51  ;;  %v3340_v20 = vmax.f32 %v1053_v46, 0.0  ;;  %v1054_v43 = vsub.f32 %v2949_v45, %v990_v17  ;;  %v991_v27 = vmul.f32 2.0, %v792_v25 }
 0x151   : > { %4144 = vst [vmem:[#allocation69_spill] sm:$0xff] %v3334_v63  ;;  %4145 = vst [vmem:[#allocation70_spill] sm:$0xff] %v3337_v44  ;;  %v3343_v54 = vpop.eup %2345  ;;  %v794_v37 = vpop.f32.mrf.mxu0  ;;  %2371 = vrsqrt.f32 %v3334_v63  ;;  %v3346_v4 = vmax.f32 %v1085_v5, 0.0  ;;  %v1086_v3 = vsub.f32 %v4147_v48, %v1022_v24  ;;  %v1023_v11 = vmul.f32 2.0, %v872_v42  ;;  %v4149_v44 = vld [vmem:[#allocation13_spill] sm:$0xff]  ;;  %v4159_v63 = vld [vmem:[#allocation19_spill] sm:$0xff] }
 0x152   : > { %v874_v29 = vpop.f32.mrf.mxu1  ;;  %v3349_v39 = vpop.eup %2347  ;;  %2373 = vrsqrt.f32 %v3340_v20  ;;  %v3352_v46 = vmax.f32 %v1054_v43, 0.0  ;;  %v1055_v45 = vsub.f32 %v4149_v44, %v991_v27  ;;  %v992_v25 = vmul.f32 2.0, %v794_v37 }
 0x153   : > { %4146 = vst [vmem:[#allocation71_spill] sm:$0xff] %v3346_v4  ;;  %4148 = vst [vmem:[#allocation23_spill] sm:$0xff] %v3349_v39  ;;  %v3355_v17 = vpop.eup %2349  ;;  %v796_v13 = vpop.f32.mrf.mxu0  ;;  %2375 = vrsqrt.f32 %v3346_v4  ;;  %v3358_v5 = vmax.f32 %v1086_v3, 0.0  ;;  %v1087_v48 = vsub.f32 %v4151_v34, %v1023_v11  ;;  %v1024_v24 = vmul.f32 2.0, %v874_v29  ;;  %v4153_v39 = vld [vmem:[#allocation14_spill] sm:$0xff] }
 0x154   : > { %v876_v42 = vpop.f32.mrf.mxu1  ;;  %v3361_v9 = vpop.eup %2351  ;;  %2377 = vrsqrt.f32 %v3352_v46  ;;  %v3364_v43 = vmax.f32 %v1055_v45, 0.0  ;;  %v1056_v44 = vsub.f32 %v4153_v39, %v992_v25  ;;  %v993_v37 = vmul.f32 2.0, %v796_v13 }
 0x155   : > { %4150 = vst [vmem:[#allocation13_spill] sm:$0xff] %v3358_v5  ;;  %4152 = vst [vmem:[#allocation21_spill] sm:$0xff] %v3361_v9  ;;  %v3367_v27 = vpop.eup %2353  ;;  %v798_v18 = vpop.f32.mrf.mxu0  ;;  %2379 = vrsqrt.f32 %v3358_v5  ;;  %v3370_v3 = vmax.f32 %v1087_v48, 0.0  ;;  %v1088_v34 = vsub.f32 %v4155_v14, %v1024_v24  ;;  %v1025_v11 = vmul.f32 2.0, %v876_v42  ;;  %v4157_v9 = vld [vmem:[#allocation9_spill] sm:$0xff] }
 0x156   : > { %v878_v29 = vpop.f32.mrf.mxu1  ;;  %v3373_v12 = vpop.eup %2355  ;;  %2381 = vrsqrt.f32 %v3364_v43  ;;  %v3376_v45 = vmax.f32 %v1056_v44, 0.0  ;;  %v1057_v39 = vsub.f32 %v4157_v9, %v993_v37  ;;  %v994_v13 = vmul.f32 2.0, %v798_v18 }
 0x157   : > { %4154 = vst [vmem:[#allocation14_spill] sm:$0xff] %v3370_v3  ;;  %4156 = vst [vmem:[#allocation22_spill] sm:$0xff] %v3373_v12  ;;  %v3379_v25 = vpop.eup %2357  ;;  %v802_v8 = vpop.f32.mrf.mxu0  ;;  %2383 = vrsqrt.f32 %v3370_v3  ;;  %v3382_v48 = vmax.f32 %v1088_v34, 0.0  ;;  %v1089_v14 = vsub.f32 %v4159_v63, %v1025_v11  ;;  %v1026_v24 = vmul.f32 2.0, %v878_v29  ;;  %v4161_v12 = vld [vmem:[#allocation10_spill] sm:$0xff]  ;;  %v4163_v3 = vld [vmem:[#allocation20_spill] sm:$0xff] }
 0x158   : > { %v882_v42 = vpop.f32.mrf.mxu1  ;;  %v3385_v4 = vpop.eup %2359  ;;  %2385 = vrsqrt.f32 %v3376_v45  ;;  %v3388_v44 = vmax.f32 %v1057_v39, 0.0  ;;  %v1058_v9 = vsub.f32 %v4161_v12, %v994_v13  ;;  %v995_v18 = vmul.f32 2.0, %v802_v8 }
 0x159   : > { %4158 = vst [vmem:[#allocation9_spill] sm:$0xff] %v3382_v48  ;;  %4160 = vst [vmem:[#allocation19_spill] sm:$0xff] %v3385_v4  ;;  %v3391_v37 = vpop.eup %2361  ;;  %v804_v5 = vpop.f32.mrf.mxu0  ;;  %2387 = vrsqrt.f32 %v3382_v48  ;;  %v3394_v34 = vmax.f32 %v1089_v14, 0.0  ;;  %v1090_v63 = vsub.f32 %v4163_v3, %v1026_v24  ;;  %v1027_v11 = vmul.f32 2.0, %v882_v42  ;;  %v4165_v4 = vld [vmem:[#allocation11_spill] sm:$0xff]  ;;  %v4167_v48 = vld [vmem:[#allocation17_spill] sm:$0xff] }
 0x15a   : > { %v884_v29 = vpop.f32.mrf.mxu1  ;;  %v3397_v32 = vpop.eup %2363  ;;  %2389 = vrsqrt.f32 %v3388_v44  ;;  %v3400_v39 = vmax.f32 %v1058_v9, 0.0  ;;  %v1059_v12 = vsub.f32 %v4165_v4, %v995_v18  ;;  %v996_v8 = vmul.f32 2.0, %v804_v5 }
 0x15b   : > { %4162 = vst [vmem:[#allocation10_spill] sm:$0xff] %v3394_v34  ;;  %4164 = vst [vmem:[#allocation20_spill] sm:$0xff] %v3397_v32  ;;  %v3403_v13 = vpop.eup %2365  ;;  %v806_v1 = vpop.f32.mrf.mxu0  ;;  %2391 = vrsqrt.f32 %v3394_v34  ;;  %v3406_v14 = vmax.f32 %v1090_v63, 0.0  ;;  %v1091_v3 = vsub.f32 %v4167_v48, %v1027_v11  ;;  %v1028_v24 = vmul.f32 2.0, %v884_v29  ;;  %v4169_v32 = vld [vmem:[#allocation12_spill] sm:$0xff]  ;;  %v4171_v34 = vld [vmem:[#allocation18_spill] sm:$0xff] }
 0x15c   : > { %v886_v42 = vpop.f32.mrf.mxu1  ;;  %v3409_v58 = vpop.eup %2367  ;;  %2393 = vrsqrt.f32 %v3400_v39  ;;  %v3412_v9 = vmax.f32 %v1059_v12, 0.0  ;;  %v1060_v4 = vsub.f32 %v4169_v32, %v996_v8  ;;  %v997_v5 = vmul.f32 2.0, %v806_v1 }
 0x15d   : > { %4166 = vst [vmem:[#allocation11_spill] sm:$0xff] %v3406_v14  ;;  %4168 = vst [vmem:[#allocation17_spill] sm:$0xff] %v3409_v58  ;;  %v3415_v18 = vpop.eup %2369  ;;  %v808_v33 = vpop.f32.mrf.mxu0  ;;  %2395 = vrsqrt.f32 %v3406_v14  ;;  %v3418_v63 = vmax.f32 %v1091_v3, 0.0  ;;  %v1092_v48 = vsub.f32 %v4171_v34, %v1028_v24  ;;  %v1029_v11 = vmul.f32 2.0, %v886_v42  ;;  %v4173_v58 = vld [vmem:[#allocation7_spill] sm:$0xff] }
 0x15e   : > { %v888_v29 = vpop.f32.mrf.mxu1  ;;  %v3421_v49 = vpop.eup %2371  ;;  %2397 = vrsqrt.f32 %v3412_v9  ;;  %v3424_v12 = vmax.f32 %v1060_v4, 0.0  ;;  %v1061_v32 = vsub.f32 %v4173_v58, %v997_v5  ;;  %v998_v1 = vmul.f32 2.0, %v808_v33  ;;  %v4175_v3 = vld [vmem:[#allocation15_spill] sm:$0xff]  ;;  %v4177_v4 = vld [vmem:[#allocation8_spill] sm:$0xff] }
 0x15f   : > { %4170 = vst [vmem:[#allocation12_spill] sm:$0xff] %v3418_v63  ;;  %4172 = vst [vmem:[#allocation18_spill] sm:$0xff] %v3421_v49  ;;  %v3427_v8 = vpop.eup %2373  ;;  %2399 = vrsqrt.f32 %v3418_v63  ;;  %v3430_v14 = vmax.f32 %v1092_v48, 0.0  ;;  %v1093_v30 = vsub.f32 %v4175_v3, %v1029_v11  ;;  %v1030_v34 = vmul.f32 2.0, %v888_v29  ;;  %v4179_v58 = vld [vmem:[#allocation16_spill] sm:$0xff] }
 0x160   : > { %v3433_v24 = vpop.eup %2375  ;;  %2401 = vrsqrt.f32 %v3424_v12  ;;  %v3436_v42 = vmax.f32 %v1061_v32, 0.0  ;;  %v1062_v49 = vsub.f32 %v4177_v4, %v998_v1  ;;  %vm1357_vm1 = vcmp.eq.f32.partialorder %v3412_v9, inf }
 0x161   : > { %4174 = vst [vmem:[#allocation7_spill] sm:$0xff] %v3430_v14  ;;  %4176 = vst [vmem:[#allocation15_spill] sm:$0xff] %v3433_v24  ;;  %v2378_v10 = vpop.eup %2377  ;;  %2403 = vrsqrt.f32 %v3430_v14  ;;  %v3440_v33 = vmax.f32 %v1093_v30, 0.0  ;;  %v1094_v5 = vsub.f32 %v4179_v58, %v1030_v34  ;;  %vm1359_vm2 = vcmp.eq.f32.partialorder %v3412_v9, 0.0 }
 0x162   : > { %v3443_v48 = vpop.eup %2379  ;;  %2405 = vrsqrt.f32 %v3436_v42  ;;  %v3446_v11 = vmax.f32 %v1062_v49, 0.0  ;;  %v1360_v49 = vand.u32 2147483648, %v3412_v9  ;;  %vm1350_vm3 = vcmp.eq.f32.partialorder %v3400_v39, inf }
 0x163   : > { %4178 = vst [vmem:[#allocation8_spill] sm:$0xff] %v3440_v33  ;;  %4180 = vst [vmem:[#allocation16_spill] sm:$0xff] %v3443_v48  ;;  %v2382_v29 = vpop.eup %2381  ;;  %2407 = vrsqrt.f32 %v3440_v33  ;;  %v3449_v32 = vmax.f32 %v1094_v5, 0.0  ;;  %vm1352_vm4 = vcmp.eq.f32.partialorder %v3400_v39, 0.0  ;;  %v1353_v5 = vand.u32 2147483648, %v3400_v39 }
 0x164   : > { %v3451_v3 = vpop.eup %2383  ;;  %2409 = vrsqrt.f32 %v3446_v11  ;;  %vm1343_vm5 = vcmp.eq.f32.partialorder %v3388_v44, inf  ;;  %vm1364_vm6 = vcmp.eq.f32.partialorder %v3424_v12, inf  ;;  %vm1345_vm7 = vcmp.eq.f32.partialorder %v3388_v44, 0.0 }
 0x165   : > { %4181 = vst [vmem:[#allocation72_spill] sm:$0xff] %v3449_v32  ;;  %4182 = vst [vmem:[#allocation73_spill] sm:$0xff] %v3451_v3  ;;  %v2386_v34 = vpop.eup %2385  ;;  %2411 = vrsqrt.f32 %v3449_v32  ;;  %v1346_v4 = vand.u32 2147483648, %v3388_v44  ;;  %vm1336_vm8 = vcmp.eq.f32.partialorder %v3376_v45, inf  ;;  %vm1366_vm9 = vcmp.eq.f32.partialorder %v3424_v12, 0.0 }
 0x166   : > { %v3460_v58 = vpop.eup %2387  ;;  %v1335_v1 = vmul.f32 %v2386_v34, %v3376_v45  ;;  %vm1338_vm10 = vcmp.eq.f32.partialorder %v3376_v45, 0.0  ;;  %v1339_v3 = vand.u32 2147483648, %v3376_v45  ;;  %vm1371_vm11 = vcmp.eq.f32.partialorder %v3436_v42, inf }
 0x167   : > { %4183 = vst [vmem:[#allocation74_spill] sm:$0xff] %v3460_v58  ;;  %v2390_v30 = vpop.eup %2389  ;;  %v1328_v58 = vmul.f32 %v2382_v29, %v3364_v43  ;;  %vm1329_vm12 = vcmp.eq.f32.partialorder %v3364_v43, inf  ;;  %vm1331_vm13 = vcmp.eq.f32.partialorder %v3364_v43, 0.0  ;;  %v1332_v34 = vand.u32 2147483648, %v3364_v43 }
 0x168   : > { %v3472_v24 = vpop.eup %2391  ;;  %v1342_v48 = vmul.f32 %v2390_v30, %v3388_v44  ;;  %v1337_v14 = vsel %vm1336_vm8, %v3376_v45, %v1335_v1  ;;  %vm1373_vm14 = vcmp.eq.f32.partialorder %v3436_v42, 0.0  ;;  %vm1378_vm15 = vcmp.eq.f32.partialorder %v3446_v11, inf }
 0x169   : > { %4184 = vst [vmem:[#allocation75_spill] sm:$0xff] %v3472_v24  ;;  %v2394_v63 = vpop.eup %2393  ;;  %v1340_v33 = vsel %vm1338_vm10, %v1339_v3, %v1337_v14  ;;  %v1330_v32 = vsel %vm1329_vm12, %v3364_v43, %v1328_v58  ;;  %vm1380_vm0 = vcmp.eq.f32.partialorder %v3446_v11, 0.0  ;;  %vm1303_vm8 = vcmp.eq.f32.partialorder %v3316_v50, 0.0 }
 0x16a   : > { %v3484_v24 = vpop.eup %2395  ;;  %v1349_v30 = vmul.f32 %v2394_v63, %v3400_v39  ;;  %v1344_v29 = vsel %vm1343_vm5, %v3388_v44, %v1342_v48  ;;  %v1632_v6 = vsub.f32 1.0, %v1340_v33  ;;  %v1333_v15 = vsel %vm1331_vm13, %v1332_v34, %v1330_v32 }
 0x16b   : > { %4185 = vst [vmem:[#allocation76_spill] sm:$0xff] %v3484_v24  ;;  %v2398_v45 = vpop.eup %2397  ;;  %v1347_v1 = vsel %vm1345_vm7, %v1346_v4, %v1344_v29  ;;  %v1321_v24 = vmul.f32 %v2378_v10, %v3352_v46  ;;  %v1631_v48 = vsub.f32 1.0, %v1333_v15  ;;  %vm1322_vm5 = vcmp.eq.f32.partialorder %v3352_v46, inf }
 0x16c   : > { %v3496_v38 = vpop.eup %2399  ;;  %v1356_v63 = vmul.f32 %v2398_v45, %v3412_v9  ;;  %v1351_v43 = vsel %vm1350_vm3, %v3400_v39, %v1349_v30  ;;  %v1633_v14 = vsub.f32 1.0, %v1347_v1  ;;  %v1696_v33 = vmax.f32 %v1632_v6, 0.0 }
 0x16d   : > { %v2402_v3 = vpop.eup %2401  ;;  %v1354_v44 = vsel %vm1352_vm4, %v1353_v5, %v1351_v43  ;;  %vm1324_vm7 = vcmp.eq.f32.partialorder %v3352_v46, 0.0  ;;  %v1695_v6 = vmax.f32 %v1631_v48, 0.0  ;;  %v1323_v30 = vsel %vm1322_vm5, %v3352_v46, %v1321_v24 }
 0x16e   : > { %v3507_v10 = vpop.eup %2403  ;;  %v1363_v32 = vmul.f32 %v2402_v3, %v3424_v12  ;;  %v1358_v4 = vsel %vm1357_vm1, %v3412_v9, %v1356_v63  ;;  %v1634_v58 = vsub.f32 1.0, %v1354_v44  ;;  %v1697_v34 = vmax.f32 %v1633_v14, 0.0 }
 0x16f   : > { %v2406_v15 = vpop.eup %2405  ;;  %v1361_v39 = vsel %vm1359_vm2, %v1360_v49, %v1358_v4  ;;  %v3515_v5 = vmul.f32 %v1696_v33, %v1696_v33  ;;  %v4186_v3 = vand.u32 2147483648, %v3424_v12  ;;  %v3530_v48 = vmul.f32 %v1695_v6, %v1695_v6 }
 0x170   : > { %v3518_v29 = vpop.eup %2407  ;;  %v1370_v45 = vmul.f32 %v2406_v15, %v3436_v42  ;;  %v1365_v1 = vsel %vm1364_vm6, %v3424_v12, %v1363_v32  ;;  %v1635_v63 = vsub.f32 1.0, %v1361_v39  ;;  %v1698_v43 = vmax.f32 %v1634_v58, 0.0 }
 0x171   : > { %v2410_v14 = vpop.eup %2409  ;;  %v1368_v9 = vsel %vm1366_vm9, %v4186_v3, %v1365_v1  ;;  %v3528_v49 = vmul.f32 %v1697_v34, %v1697_v34  ;;  %v1325_v24 = vand.u32 2147483648, %v3352_v46  ;;  %v4187_v15 = vand.u32 2147483648, %v3436_v42 }
 0x172   : > { %v3533_v44 = vpop.eup %2411  ;;  %v1377_v33 = vmul.f32 %v2410_v14, %v3446_v11  ;;  %v1372_v32 = vsel %vm1371_vm11, %v3436_v42, %v1370_v45  ;;  %v1636_v4 = vsub.f32 1.0, %v1368_v9  ;;  %v1699_v58 = vmax.f32 %v1635_v63, 0.0 }
 0x173   : > { %v1375_v12 = vsel %vm1373_vm14, %v4187_v15, %v1372_v32  ;;  %v1762_v34 = vmul.f32 %v1698_v43, %v1698_v43  ;;  %v1326_v39 = vsel %vm1324_vm7, %v1325_v24, %v1323_v30  ;;  %v1314_v6 = vmul.f32 %v3427_v8, %v3340_v20 }
 0x174   : > { %v1379_v1 = vsel %vm1378_vm15, %v3446_v11, %v1377_v33  ;;  %v1637_v14 = vsub.f32 1.0, %v1375_v12  ;;  %v1700_v45 = vmax.f32 %v1636_v4, 0.0  ;;  %v1763_v3 = vmul.f32 %v1699_v58, %v1699_v58 }
 0x175   : > { %v4188_v63 = vand.u32 2147483648, %v3446_v11  ;;  %v1630_v9 = vsub.f32 1.0, %v1326_v39  ;;  %vm1315_vm1 = vcmp.eq.f32.partialorder %v3340_v20, inf  ;;  %vm1317_vm2 = vcmp.eq.f32.partialorder %v3340_v20, 0.0 }
 0x176   : > { %v1701_v30 = vmax.f32 %v1637_v14, 0.0  ;;  %v1764_v8 = vmul.f32 %v1700_v45, %v1700_v45  ;;  %v1316_v43 = vsel %vm1315_vm1, %v3340_v20, %v1314_v6  ;;  %v1318_v33 = vand.u32 2147483648, %v3340_v20 }
 0x177   : > { %v1382_v42 = vsel %vm1380_vm0, %v4188_v63, %v1379_v1  ;;  %v1694_v24 = vmax.f32 %v1630_v9, 0.0  ;;  %v1307_v32 = vmul.f32 %v3415_v18, %v3328_v51  ;;  %vm1308_vm3 = vcmp.eq.f32.partialorder %v3328_v51, inf }
 0x178   : > { %v1638_v46 = vsub.f32 1.0, %v1382_v42  ;;  %v1765_v4 = vmul.f32 %v1701_v30, %v1701_v30  ;;  %vm1310_vm4 = vcmp.eq.f32.partialorder %v3328_v51, 0.0  ;;  %v1311_v58 = vand.u32 2147483648, %v3328_v51 }
 0x179   : > { %v1758_v15 = vmul.f32 %v1694_v24, %v1694_v24  ;;  %v1319_v12 = vsel %vm1317_vm2, %v1318_v33, %v1316_v43  ;;  %v1309_v39 = vsel %vm1308_vm3, %v3328_v51, %v1307_v32  ;;  %v1300_v6 = vmul.f32 %v3403_v13, %v3316_v50 }
 0x17a   : > { %v1702_v11 = vmax.f32 %v1638_v46, 0.0  ;;  %v1629_v20 = vsub.f32 1.0, %v1319_v12  ;;  %v1312_v14 = vsel %vm1310_vm4, %v1311_v58, %v1309_v39  ;;  %vm1301_vm6 = vcmp.eq.f32.partialorder %v3316_v50, inf }
 0x17b   : > { %v1628_v18 = vsub.f32 1.0, %v1312_v14  ;;  %v1302_v45 = vsel %vm1301_vm6, %v3316_v50, %v1300_v6  ;;  %v1304_v63 = vand.u32 2147483648, %v3316_v50  ;;  %v1293_v51 = vmul.f32 %v3391_v37, %v3304_v31 }
 0x17c   : > { %v1766_v1 = vmul.f32 %v1702_v11, %v1702_v11  ;;  %v1693_v42 = vmax.f32 %v1629_v20, 0.0  ;;  %vm1294_vm9 = vcmp.eq.f32.partialorder %v3304_v31, inf  ;;  %vm1296_vm10 = vcmp.eq.f32.partialorder %v3304_v31, 0.0 }
 0x17d   : > { %v1692_v13 = vmax.f32 %v1628_v18, 0.0  ;;  %v1305_v9 = vsel %vm1303_vm8, %v1304_v63, %v1302_v45  ;;  %v1297_v46 = vand.u32 2147483648, %v3304_v31  ;;  %v1286_v30 = vmul.f32 %v3379_v25, %v3292_v16 }
 0x17e   : > { %1810 = vmatprep.subr.mxu1 %v1766_v1  ;;  %v1757_v43 = vmul.f32 %v1693_v42, %v1693_v42  ;;  %v1627_v50 = vsub.f32 1.0, %v1305_v9  ;;  %v1295_v24 = vsel %vm1294_vm9, %v3304_v31, %v1293_v51  ;;  %vm1287_vm11 = vcmp.eq.f32.partialorder %v3292_v16, inf }
 0x17f   : > { %1811 = vmatpush1.msra.mxu1 %v1765_v4  ;;  %v1756_v37 = vmul.f32 %v1692_v13, %v1692_v13  ;;  %v1298_v33 = vsel %vm1296_vm10, %v1297_v46, %v1295_v24  ;;  %v1288_v32 = vsel %vm1287_vm11, %v3292_v16, %v1286_v30  ;;  %vm1289_vm12 = vcmp.eq.f32.partialorder %v3292_v16, 0.0 }
 0x180   : > { %1812 = vmatprep.subr.mxu1 %v1764_v8  ;;  %v1691_v11 = vmax.f32 %v1627_v50, 0.0  ;;  %v1626_v4 = vsub.f32 1.0, %v1298_v33  ;;  %v1290_v58 = vand.u32 2147483648, %v3292_v16  ;;  %v1279_v25 = vmul.f32 %v3367_v27, %v3280_v21 }
 0x181   : > { %1813 = vmatpush1.msra.mxu1 %v1763_v3  ;;  %vm1280_vm13 = vcmp.eq.f32.partialorder %v3280_v21, inf  ;;  %vm1282_vm14 = vcmp.eq.f32.partialorder %v3280_v21, 0.0  ;;  %v1283_v31 = vand.u32 2147483648, %v3280_v21  ;;  %v1272_v3 = vmul.f32 %v3355_v17, %v3268_v19 }
 0x182   : > { %1814 = vmatprep.subr.mxu1 %v1762_v34  ;;  %v1755_v34 = vmul.f32 %v1691_v11, %v1691_v11  ;;  %v1690_v8 = vmax.f32 %v1626_v4, 0.0  ;;  %v1291_v12 = vsel %vm1289_vm12, %v1290_v58, %v1288_v32  ;;  %v1281_v16 = vsel %vm1280_vm13, %v3280_v21, %v1279_v25 }
 0x183   : > { %1815 = vmatpush1.msra.mxu1 %v3528_v49  ;;  %v1625_v27 = vsub.f32 1.0, %v1291_v12  ;;  %v1284_v49 = vsel %vm1282_vm14, %v1283_v31, %v1281_v16  ;;  %vm1273_vm15 = vcmp.eq.f32.partialorder %v3268_v19, inf  ;;  %vm1275_vm0 = vcmp.eq.f32.partialorder %v3268_v19, 0.0 }
 0x184   : > { %1816 = vmatprep.subr.mxu1 %v3515_v5  ;;  %v1754_v39 = vmul.f32 %v1690_v8, %v1690_v8  ;;  %v1624_v6 = vsub.f32 1.0, %v1284_v49  ;;  %v1274_v17 = vsel %vm1273_vm15, %v3268_v19, %v1272_v3  ;;  %v1276_v5 = vand.u32 2147483648, %v3268_v19 }
 0x185   : > { %1817 = vmatpush1.msra.mxu1 %v3530_v48  ;;  %v1689_v1 = vmax.f32 %v1625_v27, 0.0  ;;  %v1265_v21 = vmul.f32 %v3343_v54, %v3256_v52  ;;  %vm1266_vm5 = vcmp.eq.f32.partialorder %v3256_v52, inf  ;;  %vm1268_vm7 = vcmp.eq.f32.partialorder %v3256_v52, 0.0 }
 0x186   : > { %1818 = vmatprep.subr.mxu1 %v1758_v15  ;;  %v1688_v48 = vmax.f32 %v1624_v6, 0.0  ;;  %v1277_v20 = vsel %vm1275_vm0, %v1276_v5, %v1274_v17  ;;  %v1269_v15 = vand.u32 2147483648, %v3256_v52  ;;  %v1258_v14 = vmul.f32 %v3331_v36, %v3244_v26 }
 0x187   : > { %1819 = vmatpush1.msra.mxu1 %v1757_v43  ;;  %v1753_v18 = vmul.f32 %v1689_v1, %v1689_v1  ;;  %v1623_v19 = vsub.f32 1.0, %v1277_v20  ;;  %v1267_v45 = vsel %vm1266_vm5, %v3256_v52, %v1265_v21  ;;  %vm1259_vm1 = vcmp.eq.f32.partialorder %v3244_v26, inf }
 0x188   : > { %1820 = vmatprep.subr.mxu1 %v1756_v37  ;;  %v1752_v54 = vmul.f32 %v1688_v48, %v1688_v48  ;;  %v1270_v63 = vsel %vm1268_vm7, %v1269_v15, %v1267_v45  ;;  %v1260_v42 = vsel %vm1259_vm1, %v3244_v26, %v1258_v14  ;;  %vm1261_vm2 = vcmp.eq.f32.partialorder %v3244_v26, 0.0 }
 0x189   : > { %1821 = vmatpush1.msra.mxu1 %v1755_v34  ;;  %v1687_v51 = vmax.f32 %v1623_v19, 0.0  ;;  %v1622_v13 = vsub.f32 1.0, %v1270_v63  ;;  %v1262_v9 = vand.u32 2147483648, %v3244_v26  ;;  %v1251_v36 = vmul.f32 %v3319_v7, %v3232_v56 }
 0x18a   : > { %1822 = vmatprep.subr.mxu1 %v1754_v39  ;;  %vm1252_vm3 = vcmp.eq.f32.partialorder %v3232_v56, inf  ;;  %vm1254_vm4 = vcmp.eq.f32.partialorder %v3232_v56, 0.0  ;;  %v1255_v52 = vand.u32 2147483648, %v3232_v56  ;;  %v1244_v46 = vmul.f32 %v3307_v47, %v3220_v53 }
 0x18b   : > { %1823 = vmatpush1.msra.mxu1 %v1753_v18  ;;  %v1751_v30 = vmul.f32 %v1687_v51, %v1687_v51  ;;  %v1686_v43 = vmax.f32 %v1622_v13, 0.0  ;;  %v1263_v50 = vsel %vm1261_vm2, %v1262_v9, %v1260_v42  ;;  %v1253_v24 = vsel %vm1252_vm3, %v3232_v56, %v1251_v36 }
 0x18c   : > { %1824 = vmatprep.subr.mxu1 %v1752_v54  ;;  %v1621_v37 = vsub.f32 1.0, %v1263_v50  ;;  %v1256_v26 = vsel %vm1254_vm4, %v1255_v52, %v1253_v24  ;;  %vm1245_vm6 = vcmp.eq.f32.partialorder %v3220_v53, inf  ;;  %vm1247_vm8 = vcmp.eq.f32.partialorder %v3220_v53, 0.0  ;;  %v4189_v52 = vld [vmem:[#allocation32_spill] sm:$0xff] }
 0x18d   : > { %1825 = vmatpush1.msra.mxu1 %v1751_v30  ;;  %v1750_v7 = vmul.f32 %v1686_v43, %v1686_v43  ;;  %v1620_v33 = vsub.f32 1.0, %v1256_v26  ;;  %v1246_v32 = vsel %vm1245_vm6, %v3220_v53, %v1244_v46  ;;  %v1248_v11 = vand.u32 2147483648, %v3220_v53  ;;  %v4190_v46 = vld [vmem:[#allocation48_spill] sm:$0xff] }
 0x18e   : > { %v1685_v4 = vmax.f32 %v1621_v37, 0.0  ;;  %v1237_v47 = vmul.f32 %v3295_v62, %v3208_v23  ;;  %vm1238_vm9 = vcmp.eq.f32.partialorder %v3208_v23, inf  ;;  %vm1240_vm10 = vcmp.eq.f32.partialorder %v3208_v23, 0.0 }
 0x18f   : > { %1826 = vmatprep.subr.mxu1 %v1750_v7  ;;  %v1684_v56 = vmax.f32 %v1620_v33, 0.0  ;;  %v1249_v58 = vsel %vm1247_vm8, %v1248_v11, %v1246_v32  ;;  %v1241_v25 = vand.u32 2147483648, %v3208_v23  ;;  %v1230_v31 = vmul.f32 %v3283_v55, %v3196_v22 }
 0x190   : > { %v1749_v3 = vmul.f32 %v1685_v4, %v1685_v4  ;;  %v1619_v34 = vsub.f32 1.0, %v1249_v58  ;;  %v1239_v53 = vsel %vm1238_vm9, %v3208_v23, %v1237_v47  ;;  %vm1231_vm11 = vcmp.eq.f32.partialorder %v3196_v22, inf  ;;  %v4191_v4 = vld [vmem:[#allocation30_spill] sm:$0xff]  ;;  %v4192_v47 = vld [vmem:[#allocation45_spill] sm:$0xff] }
 0x191   : > { %v1748_v8 = vmul.f32 %v1684_v56, %v1684_v56  ;;  %v1242_v62 = vsel %vm1240_vm10, %v1241_v25, %v1239_v53  ;;  %v1232_v12 = vsel %vm1231_vm11, %v3196_v22, %v1230_v31  ;;  %vm1233_vm12 = vcmp.eq.f32.partialorder %v3196_v22, 0.0  ;;  %v4193_v31 = vld [vmem:[#allocation28_spill] sm:$0xff] }
 0x192   : > { %1827 = vmatpush1.msra.mxu1 %v1749_v3  ;;  %v1683_v16 = vmax.f32 %v1619_v34, 0.0  ;;  %v1618_v27 = vsub.f32 1.0, %v1242_v62  ;;  %v1234_v49 = vand.u32 2147483648, %v3196_v22  ;;  %v1223_v55 = vmul.f32 %v3271_v60, %v3184_v61  ;;  %v4194_v3 = vld [vmem:[#allocation42_spill] sm:$0xff] }
 0x193   : > { %1828 = vmatprep.subr.mxu1 %v1748_v8  ;;  %vm1224_vm13 = vcmp.eq.f32.partialorder %v3184_v61, inf  ;;  %vm1226_vm14 = vcmp.eq.f32.partialorder %v3184_v61, 0.0  ;;  %v1227_v23 = vand.u32 2147483648, %v3184_v61  ;;  %v1216_v39 = vmul.f32 %v3259_v0, %v3172_v28 }
 0x194   : > { %v1747_v6 = vmul.f32 %v1683_v16, %v1683_v16  ;;  %v1682_v17 = vmax.f32 %v1618_v27, 0.0  ;;  %v1235_v5 = vsel %vm1233_vm12, %v1234_v49, %v1232_v12  ;;  %v1225_v1 = vsel %vm1224_vm13, %v3184_v61, %v1223_v55 }
 0x195   : > { %v1617_v21 = vsub.f32 1.0, %v1235_v5  ;;  %v1228_v22 = vsel %vm1226_vm14, %v1227_v23, %v1225_v1  ;;  %vm1217_vm15 = vcmp.eq.f32.partialorder %v3172_v28, inf  ;;  %vm1219_vm0 = vcmp.eq.f32.partialorder %v3172_v28, 0.0  ;;  %v4197_v1 = vld [vmem:[#allocation24_spill] sm:$0xff] }
 0x196   : > { %1829 = vmatpush1.msra.mxu1 %v1747_v6  ;;  %v1746_v60 = vmul.f32 %v1682_v17, %v1682_v17  ;;  %v1616_v48 = vsub.f32 1.0, %v1228_v22  ;;  %v1218_v20 = vsel %vm1217_vm15, %v3172_v28, %v1216_v39  ;;  %v1220_v15 = vand.u32 2147483648, %v3172_v28  ;;  %v4195_v39 = vld [vmem:[#allocation26_spill] sm:$0xff]  ;;  %v4196_v6 = vld [vmem:[#allocation39_spill] sm:$0xff] }
 0x197   : > { %v1681_v14 = vmax.f32 %v1617_v21, 0.0  ;;  %v1209_v0 = vmul.f32 %v3247_v40, %v3160_v35  ;;  %vm1210_vm5 = vcmp.eq.f32.partialorder %v3160_v35, inf  ;;  %vm1212_vm7 = vcmp.eq.f32.partialorder %v3160_v35, 0.0  ;;  %v4198_v21 = vld [vmem:[#allocation36_spill] sm:$0xff] }
 0x198   : > { %1830 = vmatprep.subr.mxu1 %v1746_v60  ;;  %v1680_v61 = vmax.f32 %v1616_v48, 0.0  ;;  %v1221_v18 = vsel %vm1219_vm0, %v1220_v15, %v1218_v20  ;;  %v1213_v19 = vand.u32 2147483648, %v3160_v35  ;;  %v1202_v45 = vmul.f32 %v3235_v41, %v3152_v59 }
 0x199   : > { %v1745_v54 = vmul.f32 %v1681_v14, %v1681_v14  ;;  %v1615_v63 = vsub.f32 1.0, %v1221_v18  ;;  %v1211_v28 = vsel %vm1210_vm5, %v3160_v35, %v1209_v0  ;;  %vm1203_vm1 = vcmp.eq.f32.partialorder %v3152_v59, inf }
 0x19a   : > { %v1744_v42 = vmul.f32 %v1680_v61, %v1680_v61  ;;  %v1214_v40 = vsel %vm1212_vm7, %v1213_v19, %v1211_v28  ;;  %v1204_v51 = vsel %vm1203_vm1, %v3152_v59, %v1202_v45  ;;  %vm1205_vm2 = vcmp.eq.f32.partialorder %v3152_v59, 0.0 }
 0x19b   : > { %1831 = vmatpush1.msra.mxu1 %v1745_v54  ;;  %v1679_v13 = vmax.f32 %v1615_v63, 0.0  ;;  %v1614_v9 = vsub.f32 1.0, %v1214_v40  ;;  %v1206_v36 = vand.u32 2147483648, %v3152_v59  ;;  %v1195_v41 = vmul.f32 %v3223_v57, %v3144_v2  ;;  %v4199_v63 = vld [vmem:[#allocation72_spill] sm:$0xff] }
 0x19c   : > { %1832 = vmatprep.subr.mxu1 %v1744_v42  ;;  %vm1196_vm3 = vcmp.eq.f32.partialorder %v3144_v2, inf  ;;  %vm1198_vm4 = vcmp.eq.f32.partialorder %v3144_v2, 0.0  ;;  %v1199_v35 = vand.u32 2147483648, %v3144_v2  ;;  %v1188_v30 = vmul.f32 %v4190_v46, %v4189_v52 }
 0x19d   : > { %v1743_v43 = vmul.f32 %v1679_v13, %v1679_v13  ;;  %v1678_v50 = vmax.f32 %v1614_v9, 0.0  ;;  %v1207_v24 = vsel %vm1205_vm2, %v1206_v36, %v1204_v51  ;;  %v1197_v37 = vsel %vm1196_vm3, %v3144_v2, %v1195_v41  ;;  %v4200_v13 = vld [vmem:[#allocation8_spill] sm:$0xff] }
 0x19e   : > { %v1613_v26 = vsub.f32 1.0, %v1207_v24  ;;  %v1200_v59 = vsel %vm1198_vm4, %v1199_v35, %v1197_v37  ;;  %vm1189_vm6 = vcmp.eq.f32.partialorder %v4189_v52, inf  ;;  %vm1191_vm8 = vcmp.eq.f32.partialorder %v4189_v52, 0.0  ;;  %v4201_v24 = vld [vmem:[#allocation7_spill] sm:$0xff] }
 0x19f   : > { %1833 = vmatpush1.msra.mxu1 %v1743_v43  ;;  %v1742_v57 = vmul.f32 %v1678_v50, %v1678_v50  ;;  %v1612_v7 = vsub.f32 1.0, %v1200_v59  ;;  %v1190_v33 = vsel %vm1189_vm6, %v4189_v52, %v1188_v30  ;;  %v1192_v32 = vand.u32 2147483648, %v4189_v52 }
 0x1a0   : > { %v1677_v11 = vmax.f32 %v1613_v26, 0.0  ;;  %v1181_v56 = vmul.f32 %v4192_v47, %v4191_v4  ;;  %vm1182_vm9 = vcmp.eq.f32.partialorder %v4191_v4, inf  ;;  %vm1184_vm10 = vcmp.eq.f32.partialorder %v4191_v4, 0.0  ;;  %v4202_v26 = vld [vmem:[#allocation12_spill] sm:$0xff] }
 0x1a1   : > { %1834 = vmatprep.subr.mxu1 %v1742_v57  ;;  %v1676_v2 = vmax.f32 %v1612_v7, 0.0  ;;  %v1193_v58 = vsel %vm1191_vm8, %v1192_v32, %v1190_v33  ;;  %v1185_v25 = vand.u32 2147483648, %v4191_v4  ;;  %v1174_v34 = vmul.f32 %v4194_v3, %v4193_v31 }
 0x1a2   : > { %v1741_v53 = vmul.f32 %v1677_v11, %v1677_v11  ;;  %v1611_v8 = vsub.f32 1.0, %v1193_v58  ;;  %v1183_v62 = vsel %vm1182_vm9, %v4191_v4, %v1181_v56  ;;  %vm1175_vm11 = vcmp.eq.f32.partialorder %v4193_v31, inf }
 0x1a3   : > { %v1740_v12 = vmul.f32 %v1676_v2, %v1676_v2  ;;  %v1186_v16 = vsel %vm1184_vm10, %v1185_v25, %v1183_v62  ;;  %v1176_v27 = vsel %vm1175_vm11, %v4193_v31, %v1174_v34  ;;  %vm1177_vm12 = vcmp.eq.f32.partialorder %v4193_v31, 0.0  ;;  %v4204_v25 = vld [vmem:[#allocation76_spill] sm:$0xff]  ;;  %v4206_v62 = vld [vmem:[#allocation75_spill] sm:$0xff] }
 0x1a4   : > { %1835 = vmatpush1.msra.mxu1 %v1741_v53  ;;  %v1675_v49 = vmax.f32 %v1611_v8, 0.0  ;;  %v1610_v55 = vsub.f32 1.0, %v1186_v16  ;;  %v1178_v23 = vand.u32 2147483648, %v4193_v31  ;;  %v1167_v17 = vmul.f32 %v4196_v6, %v4195_v39  ;;  %v4205_v8 = vld [vmem:[#allocation10_spill] sm:$0xff] }
 0x1a5   : > { %1836 = vmatprep.subr.mxu1 %v1740_v12  ;;  %vm1168_vm13 = vcmp.eq.f32.partialorder %v4195_v39, inf  ;;  %vm1170_vm14 = vcmp.eq.f32.partialorder %v4195_v39, 0.0  ;;  %v1171_v5 = vand.u32 2147483648, %v4195_v39  ;;  %v1160_v22 = vmul.f32 %v4198_v21, %v4197_v1  ;;  %v4208_v21 = vld [vmem:[#allocation74_spill] sm:$0xff] }
 0x1a6   : > { %v1739_v60 = vmul.f32 %v1675_v49, %v1675_v49  ;;  %v1674_v48 = vmax.f32 %v1610_v55, 0.0  ;;  %v1179_v20 = vsel %vm1177_vm12, %v1178_v23, %v1176_v27  ;;  %v1169_v15 = vsel %vm1168_vm13, %v4195_v39, %v1167_v17 }
 0x1a7   : > { %v1609_v14 = vsub.f32 1.0, %v1179_v20  ;;  %v1172_v0 = vsel %vm1170_vm14, %v1171_v5, %v1169_v15  ;;  %vm1161_vm15 = vcmp.eq.f32.partialorder %v4197_v1, inf  ;;  %vm1163_vm0 = vcmp.eq.f32.partialorder %v4197_v1, 0.0  ;;  %v4210_v20 = vld [vmem:[#allocation73_spill] sm:$0xff] }
 0x1a8   : > { %1837 = vmatpush1.msra.mxu1 %v1739_v60  ;;  %v1738_v61 = vmul.f32 %v1674_v48, %v1674_v48  ;;  %v1608_v18 = vsub.f32 1.0, %v1172_v0  ;;  %v1162_v19 = vsel %vm1161_vm15, %v4197_v1, %v1160_v22  ;;  %v1164_v45 = vand.u32 2147483648, %v4197_v1  ;;  %v4207_v1 = vld [vmem:[#allocation9_spill] sm:$0xff]  ;;  %v4209_v48 = vld [vmem:[#allocation14_spill] sm:$0xff] }
 0x1a9   : > { %v1673_v54 = vmax.f32 %v1609_v14, 0.0  ;;  %v1601_v28 = vmul.f32 %v3533_v44, %v4199_v63  ;;  %vm1602_vm5 = vcmp.eq.f32.partialorder %v4199_v63, inf  ;;  %vm1604_vm7 = vcmp.eq.f32.partialorder %v4199_v63, 0.0 }
 0x1aa   : > { %1838 = vmatprep.subr.mxu1 %v1738_v61  ;;  %v1672_v42 = vmax.f32 %v1608_v18, 0.0  ;;  %v1165_v40 = vsel %vm1163_vm0, %v1164_v45, %v1162_v19  ;;  %v1605_v51 = vand.u32 2147483648, %v4199_v63  ;;  %v1594_v9 = vmul.f32 %v3518_v29, %v4200_v13 }
 0x1ab   : > { %v1737_v36 = vmul.f32 %v1673_v54, %v1673_v54  ;;  %v1607_v41 = vsub.f32 1.0, %v1165_v40  ;;  %v1603_v35 = vsel %vm1602_vm5, %v4199_v63, %v1601_v28  ;;  %vm1595_vm1 = vcmp.eq.f32.partialorder %v4200_v13, inf }
 0x1ac   : > { %v1736_v52 = vmul.f32 %v1672_v42, %v1672_v42  ;;  %v1606_v44 = vsel %vm1604_vm7, %v1605_v51, %v1603_v35  ;;  %v1596_v46 = vsel %vm1595_vm1, %v4200_v13, %v1594_v9  ;;  %vm1597_vm2 = vcmp.eq.f32.partialorder %v4200_v13, 0.0  ;;  %v4211_v51 = vld [vmem:[#allocation13_spill] sm:$0xff] }
 0x1ad   : > { %1839 = vmatpush1.msra.mxu1 %v1737_v36  ;;  %v1671_v30 = vmax.f32 %v1607_v41, 0.0  ;;  %v1670_v43 = vsub.f32 1.0, %v1606_v44  ;;  %v1598_v50 = vand.u32 2147483648, %v4200_v13  ;;  %v1587_v29 = vmul.f32 %v3507_v10, %v4201_v24  ;;  %v4212_v13 = vld [vmem:[#allocation16_spill] sm:$0xff]  ;;  %v4214_v44 = vld [vmem:[#allocation15_spill] sm:$0xff] }
 0x1ae   : > { %1840 = vmatprep.subr.mxu1 %v1736_v52  ;;  %vm1588_vm3 = vcmp.eq.f32.partialorder %v4201_v24, inf  ;;  %vm1590_vm4 = vcmp.eq.f32.partialorder %v4201_v24, 0.0  ;;  %v1591_v37 = vand.u32 2147483648, %v4201_v24  ;;  %v1580_v59 = vmul.f32 %v3496_v38, %v4202_v26  ;;  %v4203_v38 = vld [vmem:[#allocation11_spill] sm:$0xff] }
 0x1af   : > { %v1735_v57 = vmul.f32 %v1671_v30, %v1671_v30  ;;  %v1734_v7 = vmax.f32 %v1670_v43, 0.0  ;;  %v1599_v33 = vsel %vm1597_vm2, %v1598_v50, %v1596_v46  ;;  %v1589_v32 = vsel %vm1588_vm3, %v4201_v24, %v1587_v29  ;;  %v4213_v52 = vld [vmem:[#allocation71_spill] sm:$0xff] }
 0x1b0   : > { %v1669_v11 = vsub.f32 1.0, %v1599_v33  ;;  %v1592_v4 = vsel %vm1590_vm4, %v1591_v37, %v1589_v32  ;;  %vm1581_vm6 = vcmp.eq.f32.partialorder %v4202_v26, inf  ;;  %vm1583_vm8 = vcmp.eq.f32.partialorder %v4202_v26, 0.0  ;;  %v4216_v33 = vld [vmem:[#allocation18_spill] sm:$0xff] }
 0x1b1   : > { %1841 = vmatpush1.msra.mxu1 %v1735_v57  ;;  %v1798_v10 = vmul.f32 %v1734_v7, %v1734_v7  ;;  %v1668_v47 = vsub.f32 1.0, %v1592_v4  ;;  %v1582_v56 = vsel %vm1581_vm6, %v4202_v26, %v1580_v59  ;;  %v1584_v2 = vand.u32 2147483648, %v4202_v26  ;;  %v4215_v7 = vld [vmem:[#allocation69_spill] sm:$0xff]  ;;  %v4217_v4 = vld [vmem:[#allocation67_spill] sm:$0xff] }
 0x1b2   : > { %v1733_v58 = vmax.f32 %v1669_v11, 0.0  ;;  %v1573_v31 = vmul.f32 %v4204_v25, %v4203_v38  ;;  %vm1574_vm9 = vcmp.eq.f32.partialorder %v4203_v38, inf  ;;  %vm1576_vm10 = vcmp.eq.f32.partialorder %v4203_v38, 0.0 }
 0x1b3   : > { %1842 = vmatprep.subr.mxu1 %v1798_v10  ;;  %v1732_v3 = vmax.f32 %v1668_v47, 0.0  ;;  %v1585_v34 = vsel %vm1583_vm8, %v1584_v2, %v1582_v56  ;;  %v1577_v53 = vand.u32 2147483648, %v4203_v38  ;;  %v1566_v12 = vmul.f32 %v4206_v62, %v4205_v8  ;;  %v4218_v10 = vld [vmem:[#allocation17_spill] sm:$0xff] }
 0x1b4   : > { %v1797_v16 = vmul.f32 %v1733_v58, %v1733_v58  ;;  %v1667_v27 = vsub.f32 1.0, %v1585_v34  ;;  %v1575_v49 = vsel %vm1574_vm9, %v4203_v38, %v1573_v31  ;;  %vm1567_vm11 = vcmp.eq.f32.partialorder %v4205_v8, inf }
 0x1b5   : > { %v1796_v55 = vmul.f32 %v1732_v3, %v1732_v3  ;;  %v1578_v23 = vsel %vm1576_vm10, %v1577_v53, %v1575_v49  ;;  %v1568_v39 = vsel %vm1567_vm11, %v4205_v8, %v1566_v12  ;;  %vm1569_vm12 = vcmp.eq.f32.partialorder %v4205_v8, 0.0  ;;  %v4219_v12 = vld [vmem:[#allocation65_spill] sm:$0xff] }
 0x1b6   : > { %1843 = vmatpush2.msra.mxu1 %v1797_v16  ;;  %v1731_v6 = vmax.f32 %v1667_v27, 0.0  ;;  %v1666_v17 = vsub.f32 1.0, %v1578_v23  ;;  %v1570_v5 = vand.u32 2147483648, %v4205_v8  ;;  %v1559_v22 = vmul.f32 %v4208_v21, %v4207_v1  ;;  %v4220_v16 = vld [vmem:[#allocation20_spill] sm:$0xff] }
 0x1b7   : > { %1844 = vmatprep.subr.mxu1 %v1796_v55  ;;  %vm1560_vm13 = vcmp.eq.f32.partialorder %v4207_v1, inf  ;;  %vm1562_vm14 = vcmp.eq.f32.partialorder %v4207_v1, 0.0  ;;  %v1563_v60 = vand.u32 2147483648, %v4207_v1  ;;  %v1552_v15 = vmul.f32 %v4210_v20, %v4209_v48 }
 0x1b8   : > { %v1795_v14 = vmul.f32 %v1731_v6, %v1731_v6  ;;  %v1730_v0 = vmax.f32 %v1666_v17, 0.0  ;;  %v1571_v61 = vsel %vm1569_vm12, %v1570_v5, %v1568_v39  ;;  %v1561_v18 = vsel %vm1560_vm13, %v4207_v1, %v1559_v22  ;;  %v4221_v39 = vld [vmem:[#allocation63_spill] sm:$0xff] }
 0x1b9   : > { %v1665_v19 = vsub.f32 1.0, %v1571_v61  ;;  %v1564_v45 = vsel %vm1562_vm14, %v1563_v60, %v1561_v18  ;;  %vm1553_vm15 = vcmp.eq.f32.partialorder %v4209_v48, inf  ;;  %vm1555_vm0 = vcmp.eq.f32.partialorder %v4209_v48, 0.0  ;;  %v4222_v6 = vld [vmem:[#allocation19_spill] sm:$0xff]  ;;  %v4224_v61 = vld [vmem:[#allocation22_spill] sm:$0xff] }
 0x1ba   : > { %1845 = vmatpush2.msra.mxu1 %v1795_v14  ;;  %v1794_v54 = vmul.f32 %v1730_v0, %v1730_v0  ;;  %v1664_v63 = vsub.f32 1.0, %v1564_v45  ;;  %v1554_v28 = vsel %vm1553_vm15, %v4209_v48, %v1552_v15  ;;  %v1556_v42 = vand.u32 2147483648, %v4209_v48  ;;  %v4223_v0 = vld [vmem:[#allocation61_spill] sm:$0xff]  ;;  %v4225_v45 = vld [vmem:[#allocation59_spill] sm:$0xff] }
 0x1bb   : > { %v1729_v40 = vmax.f32 %v1665_v19, 0.0  ;;  %v1545_v9 = vmul.f32 %v4212_v13, %v4211_v51  ;;  %vm1546_vm5 = vcmp.eq.f32.partialorder %v4211_v51, inf  ;;  %vm1548_vm7 = vcmp.eq.f32.partialorder %v4211_v51, 0.0 }
 0x1bc   : > { %1846 = vmatprep.subr.mxu1 %v1794_v54  ;;  %v1728_v36 = vmax.f32 %v1664_v63, 0.0  ;;  %v1557_v41 = vsel %vm1555_vm0, %v1556_v42, %v1554_v28  ;;  %v1549_v35 = vand.u32 2147483648, %v4211_v51  ;;  %v1538_v46 = vmul.f32 %v4214_v44, %v4213_v52  ;;  %v4226_v54 = vld [vmem:[#allocation21_spill] sm:$0xff] }
 0x1bd   : > { %v1793_v30 = vmul.f32 %v1729_v40, %v1729_v40  ;;  %v1663_v43 = vsub.f32 1.0, %v1557_v41  ;;  %v1547_v50 = vsel %vm1546_vm5, %v4211_v51, %v1545_v9  ;;  %vm1539_vm1 = vcmp.eq.f32.partialorder %v4213_v52, inf }
 0x1be   : > { %v1792_v24 = vmul.f32 %v1728_v36, %v1728_v36  ;;  %v1550_v29 = vsel %vm1548_vm7, %v1549_v35, %v1547_v50  ;;  %v1540_v37 = vsel %vm1539_vm1, %v4213_v52, %v1538_v46  ;;  %vm1541_vm2 = vcmp.eq.f32.partialorder %v4213_v52, 0.0  ;;  %v4227_v46 = vld [vmem:[#allocation57_spill] sm:$0xff] }
 0x1bf   : > { %1847 = vmatpush2.msra.mxu1 %v1793_v30  ;;  %v1727_v26 = vmax.f32 %v1663_v43, 0.0  ;;  %v1662_v59 = vsub.f32 1.0, %v1550_v29  ;;  %v1542_v57 = vand.u32 2147483648, %v4213_v52  ;;  %v1531_v32 = vmul.f32 %v4216_v33, %v4215_v7  ;;  %v4228_v30 = vld [vmem:[#allocation23_spill] sm:$0xff] }
 0x1c0   : > { %1848 = vmatprep.subr.mxu1 %v1792_v24  ;;  %vm1532_vm3 = vcmp.eq.f32.partialorder %v4215_v7, inf  ;;  %vm1534_vm4 = vcmp.eq.f32.partialorder %v4215_v7, 0.0  ;;  %v1535_v11 = vand.u32 2147483648, %v4215_v7  ;;  %v1524_v47 = vmul.f32 %v4218_v10, %v4217_v4 }
 0x1c1   : > { %v1791_v56 = vmul.f32 %v1727_v26, %v1727_v26  ;;  %v1726_v2 = vmax.f32 %v1662_v59, 0.0  ;;  %v1543_v58 = vsel %vm1541_vm2, %v1542_v57, %v1540_v37  ;;  %v1533_v38 = vsel %vm1532_vm3, %v4215_v7, %v1531_v32  ;;  %v4229_v37 = vld [vmem:[#allocation55_spill] sm:$0xff]  ;;  %v4230_v26 = vld [vmem:[#allocation70_spill] sm:$0xff] }
 0x1c2   : > { %v1661_v25 = vsub.f32 1.0, %v1543_v58  ;;  %v1536_v31 = vsel %vm1534_vm4, %v1535_v11, %v1533_v38  ;;  %vm1525_vm6 = vcmp.eq.f32.partialorder %v4217_v4, inf  ;;  %vm1527_vm8 = vcmp.eq.f32.partialorder %v4217_v4, 0.0  ;;  %v4232_v58 = vld [vmem:[#allocation68_spill] sm:$0xff] }
 0x1c3   : > { %1849 = vmatpush2.msra.mxu1 %v1791_v56  ;;  %v1790_v3 = vmul.f32 %v1726_v2, %v1726_v2  ;;  %v1660_v34 = vsub.f32 1.0, %v1536_v31  ;;  %v1526_v53 = vsel %vm1525_vm6, %v4217_v4, %v1524_v47  ;;  %v1528_v8 = vand.u32 2147483648, %v4217_v4  ;;  %v4231_v2 = vld [vmem:[#allocation53_spill] sm:$0xff]  ;;  %v4233_v31 = vld [vmem:[#allocation51_spill] sm:$0xff] }
 0x1c4   : > { %v1725_v62 = vmax.f32 %v1661_v25, 0.0  ;;  %v1517_v27 = vmul.f32 %v4220_v16, %v4219_v12  ;;  %vm1518_vm9 = vcmp.eq.f32.partialorder %v4219_v12, inf  ;;  %vm1520_vm10 = vcmp.eq.f32.partialorder %v4219_v12, 0.0 }
 0x1c5   : > { %1850 = vmatprep.subr.mxu1 %v1790_v3  ;;  %v1724_v49 = vmax.f32 %v1660_v34, 0.0  ;;  %v1529_v55 = vsel %vm1527_vm8, %v1528_v8, %v1526_v53  ;;  %v1521_v23 = vand.u32 2147483648, %v4219_v12  ;;  %v1510_v17 = vmul.f32 %v4222_v6, %v4221_v39  ;;  %v4234_v3 = vld [vmem:[#allocation66_spill] sm:$0xff] }
 0x1c6   : > { %v1789_v5 = vmul.f32 %v1725_v62, %v1725_v62  ;;  %v1659_v1 = vsub.f32 1.0, %v1529_v55  ;;  %v1519_v21 = vsel %vm1518_vm9, %v4219_v12, %v1517_v27  ;;  %vm1511_vm11 = vcmp.eq.f32.partialorder %v4221_v39, inf }
 0x1c7   : > { %v1788_v22 = vmul.f32 %v1724_v49, %v1724_v49  ;;  %v1522_v60 = vsel %vm1520_vm10, %v1521_v23, %v1519_v21  ;;  %v1512_v48 = vsel %vm1511_vm11, %v4221_v39, %v1510_v17  ;;  %vm1513_vm12 = vcmp.eq.f32.partialorder %v4221_v39, 0.0  ;;  %v4235_v17 = vld [vmem:[#allocation49_spill] sm:$0xff] }
 0x1c8   : > { %1851 = vmatpush2.msra.mxu1 %v1789_v5  ;;  %v1723_v20 = vmax.f32 %v1659_v1, 0.0  ;;  %v1658_v15 = vsub.f32 1.0, %v1522_v60  ;;  %v1514_v14 = vand.u32 2147483648, %v4221_v39  ;;  %v1503_v18 = vmul.f32 %v4224_v61, %v4223_v0  ;;  %v4236_v5 = vld [vmem:[#allocation64_spill] sm:$0xff] }
 0x1c9   : > { %1852 = vmatprep.subr.mxu1 %v1788_v22  ;;  %vm1504_vm13 = vcmp.eq.f32.partialorder %v4223_v0, inf  ;;  %vm1506_vm14 = vcmp.eq.f32.partialorder %v4223_v0, 0.0  ;;  %v1507_v19 = vand.u32 2147483648, %v4223_v0  ;;  %v1496_v63 = vmul.f32 %v4226_v54, %v4225_v45 }
 0x1ca   : > { %v1787_v28 = vmul.f32 %v1723_v20, %v1723_v20  ;;  %v1722_v42 = vmax.f32 %v1658_v15, 0.0  ;;  %v1515_v40 = vsel %vm1513_vm12, %v1514_v14, %v1512_v48  ;;  %v1505_v51 = vsel %vm1504_vm13, %v4223_v0, %v1503_v18  ;;  %v4237_v48 = vld [vmem:[#allocation46_spill] sm:$0xff] }
 0x1cb   : > { %v1657_v13 = vsub.f32 1.0, %v1515_v40  ;;  %v1508_v9 = vsel %vm1506_vm14, %v1507_v19, %v1505_v51  ;;  %vm1497_vm15 = vcmp.eq.f32.partialorder %v4225_v45, inf  ;;  %vm1499_vm0 = vcmp.eq.f32.partialorder %v4225_v45, 0.0  ;;  %v4238_v20 = vld [vmem:[#allocation62_spill] sm:$0xff]  ;;  %v4240_v40 = vld [vmem:[#allocation60_spill] sm:$0xff] }
 0x1cc   : > { %1853 = vmatpush2.msra.mxu1 %v1787_v28  ;;  %v1786_v36 = vmul.f32 %v1722_v42, %v1722_v42  ;;  %v1656_v41 = vsub.f32 1.0, %v1508_v9  ;;  %v1498_v35 = vsel %vm1497_vm15, %v4225_v45, %v1496_v63  ;;  %v1500_v52 = vand.u32 2147483648, %v4225_v45  ;;  %v4239_v42 = vld [vmem:[#allocation43_spill] sm:$0xff]  ;;  %v4241_v9 = vld [vmem:[#allocation40_spill] sm:$0xff] }
 0x1cd   : > { %v1721_v44 = vmax.f32 %v1657_v13, 0.0  ;;  %v1489_v43 = vmul.f32 %v4228_v30, %v4227_v46  ;;  %vm1490_vm5 = vcmp.eq.f32.partialorder %v4227_v46, inf  ;;  %vm1492_vm7 = vcmp.eq.f32.partialorder %v4227_v46, 0.0 }
 0x1ce   : > { %1854 = vmatprep.subr.mxu1 %v1786_v36  ;;  %v1720_v50 = vmax.f32 %v1656_v41, 0.0  ;;  %v1501_v24 = vsel %vm1499_vm0, %v1500_v52, %v1498_v35  ;;  %v1493_v29 = vand.u32 2147483648, %v4227_v46  ;;  %v1482_v59 = vmul.f32 %v4230_v26, %v4229_v37  ;;  %v4242_v36 = vld [vmem:[#allocation58_spill] sm:$0xff] }
 0x1cf   : > { %v1785_v57 = vmul.f32 %v1721_v44, %v1721_v44  ;;  %v1655_v7 = vsub.f32 1.0, %v1501_v24  ;;  %v1491_v33 = vsel %vm1490_vm5, %v4227_v46, %v1489_v43  ;;  %vm1483_vm1 = vcmp.eq.f32.partialorder %v4229_v37, inf }
 0x1d0   : > { %v1784_v32 = vmul.f32 %v1720_v50, %v1720_v50  ;;  %v1494_v11 = vsel %vm1492_vm7, %v1493_v29, %v1491_v33  ;;  %v1484_v4 = vsel %vm1483_vm1, %v4229_v37, %v1482_v59  ;;  %vm1485_vm2 = vcmp.eq.f32.partialorder %v4229_v37, 0.0  ;;  %v4243_v59 = vld [vmem:[#allocation37_spill] sm:$0xff] }
 0x1d1   : > { %1855 = vmatpush2.msra.mxu1 %v1785_v57  ;;  %v1719_v10 = vmax.f32 %v1655_v7, 0.0  ;;  %v1654_v47 = vsub.f32 1.0, %v1494_v11  ;;  %v1486_v56 = vand.u32 2147483648, %v4229_v37  ;;  %v1475_v38 = vmul.f32 %v4232_v58, %v4231_v2  ;;  %v4244_v57 = vld [vmem:[#allocation56_spill] sm:$0xff] }
 0x1d2   : > { %1856 = vmatprep.subr.mxu1 %v1784_v32  ;;  %vm1476_vm3 = vcmp.eq.f32.partialorder %v4231_v2, inf  ;;  %vm1478_vm4 = vcmp.eq.f32.partialorder %v4231_v2, 0.0  ;;  %v1479_v25 = vand.u32 2147483648, %v4231_v2  ;;  %v1468_v34 = vmul.f32 %v4234_v3, %v4233_v31 }
 0x1d3   : > { %v1783_v53 = vmul.f32 %v1719_v10, %v1719_v10  ;;  %v1718_v8 = vmax.f32 %v1654_v47, 0.0  ;;  %v1487_v62 = vsel %vm1485_vm2, %v1486_v56, %v1484_v4  ;;  %v1477_v12 = vsel %vm1476_vm3, %v4231_v2, %v1475_v38  ;;  %v4245_v4 = vld [vmem:[#allocation35_spill] sm:$0xff]  ;;  %v4246_v10 = vld [vmem:[#allocation54_spill] sm:$0xff] }
 0x1d4   : > { %v1653_v16 = vsub.f32 1.0, %v1487_v62  ;;  %v1480_v27 = vsel %vm1478_vm4, %v1479_v25, %v1477_v12  ;;  %vm1469_vm6 = vcmp.eq.f32.partialorder %v4233_v31, inf  ;;  %vm1471_vm8 = vcmp.eq.f32.partialorder %v4233_v31, 0.0  ;;  %v4248_v62 = vld [vmem:[#allocation52_spill] sm:$0xff] }
 0x1d5   : > { %1857 = vmatpush2.msra.mxu1 %v1783_v53  ;;  %v1782_v49 = vmul.f32 %v1718_v8, %v1718_v8  ;;  %v1652_v55 = vsub.f32 1.0, %v1480_v27  ;;  %v1470_v23 = vsel %vm1469_vm6, %v4233_v31, %v1468_v34  ;;  %v1472_v39 = vand.u32 2147483648, %v4233_v31  ;;  %v4247_v8 = vld [vmem:[#allocation34_spill] sm:$0xff]  ;;  %v4250_v27 = vld [vmem:[#allocation33_spill] sm:$0xff] }
 0x1d6   : > { %v1717_v6 = vmax.f32 %v1653_v16, 0.0  ;;  %v1461_v1 = vmul.f32 %v4236_v5, %v4235_v17  ;;  %vm1462_vm9 = vcmp.eq.f32.partialorder %v4235_v17, inf  ;;  %vm1464_vm10 = vcmp.eq.f32.partialorder %v4235_v17, 0.0 }
 0x1d7   : > { %1858 = vmatprep.subr.mxu1 %v1782_v49  ;;  %v1716_v21 = vmax.f32 %v1652_v55, 0.0  ;;  %v1473_v22 = vsel %vm1471_vm8, %v1472_v39, %v1470_v23  ;;  %v1465_v60 = vand.u32 2147483648, %v4235_v17  ;;  %v1454_v15 = vmul.f32 %v4238_v20, %v4237_v48  ;;  %v4251_v49 = vld [vmem:[#allocation50_spill] sm:$0xff] }
 0x1d8   : > { %v1781_v14 = vmul.f32 %v1717_v6, %v1717_v6  ;;  %v1651_v0 = vsub.f32 1.0, %v1473_v22  ;;  %v1463_v61 = vsel %vm1462_vm9, %v4235_v17, %v1461_v1  ;;  %vm1455_vm11 = vcmp.eq.f32.partialorder %v4237_v48, inf }
 0x1d9   : > { %v1780_v18 = vmul.f32 %v1716_v21, %v1716_v21  ;;  %v1466_v19 = vsel %vm1464_vm10, %v1465_v60, %v1463_v61  ;;  %v1456_v45 = vsel %vm1455_vm11, %v4237_v48, %v1454_v15  ;;  %vm1457_vm12 = vcmp.eq.f32.partialorder %v4237_v48, 0.0  ;;  %v4252_v15 = vld [vmem:[#allocation31_spill] sm:$0xff] }
 0x1da   : > { %1859 = vmatpush2.msra.mxu1 %v1781_v14  ;;  %v1715_v54 = vmax.f32 %v1651_v0, 0.0  ;;  %v1650_v63 = vsub.f32 1.0, %v1466_v19  ;;  %v1458_v28 = vand.u32 2147483648, %v4237_v48  ;;  %v1447_v51 = vmul.f32 %v4240_v40, %v4239_v42  ;;  %v4253_v14 = vld [vmem:[#allocation47_spill] sm:$0xff] }
 0x1db   : > { %1860 = vmatprep.subr.mxu1 %v1780_v18  ;;  %vm1448_vm13 = vcmp.eq.f32.partialorder %v4239_v42, inf  ;;  %vm1450_vm14 = vcmp.eq.f32.partialorder %v4239_v42, 0.0  ;;  %v1451_v13 = vand.u32 2147483648, %v4239_v42  ;;  %v1440_v41 = vmul.f32 %v4242_v36, %v4241_v9 }
 0x1dc   : > { %v1779_v35 = vmul.f32 %v1715_v54, %v1715_v54  ;;  %v1714_v52 = vmax.f32 %v1650_v63, 0.0  ;;  %v1459_v44 = vsel %vm1457_vm12, %v1458_v28, %v1456_v45  ;;  %v1449_v46 = vsel %vm1448_vm13, %v4239_v42, %v1447_v51  ;;  %v4254_v45 = vld [vmem:[#allocation29_spill] sm:$0xff]  ;;  %v4255_v54 = vld [vmem:[#allocation44_spill] sm:$0xff] }
 0x1dd   : > { %v1649_v30 = vsub.f32 1.0, %v1459_v44  ;;  %v1452_v43 = vsel %vm1450_vm14, %v1451_v13, %v1449_v46  ;;  %vm1441_vm15 = vcmp.eq.f32.partialorder %v4241_v9, inf  ;;  %vm1443_vm0 = vcmp.eq.f32.partialorder %v4241_v9, 0.0  ;;  %v4257_v44 = vld [vmem:[#allocation41_spill] sm:$0xff] }
 0x1de   : > { %1861 = vmatpush2.msra.mxu1 %v1779_v35  ;;  %v1778_v50 = vmul.f32 %v1714_v52, %v1714_v52  ;;  %v1648_v24 = vsub.f32 1.0, %v1452_v43  ;;  %v1442_v29 = vsel %vm1441_vm15, %v4241_v9, %v1440_v41  ;;  %v1444_v37 = vand.u32 2147483648, %v4241_v9  ;;  %v4256_v52 = vld [vmem:[#allocation27_spill] sm:$0xff]  ;;  %v4258_v43 = vld [vmem:[#allocation25_spill] sm:$0xff] }
 0x1df   : > { %v1713_v26 = vmax.f32 %v1649_v30, 0.0  ;;  %v1433_v7 = vmul.f32 %v4244_v57, %v4243_v59  ;;  %vm1434_vm5 = vcmp.eq.f32.partialorder %v4243_v59, inf  ;;  %vm1436_vm7 = vcmp.eq.f32.partialorder %v4243_v59, 0.0  ;;  %v3902_v57 = vld [vmem:[%s332_s11] sm:$0x3] }
 0x1e0   : > { %1862 = vmatprep.subr.mxu1 %v1778_v50  ;;  %v1712_v33 = vmax.f32 %v1648_v24, 0.0  ;;  %v1445_v32 = vsel %vm1443_vm0, %v1444_v37, %v1442_v29  ;;  %v1437_v11 = vand.u32 2147483648, %v4243_v59  ;;  %v1426_v47 = vmul.f32 %v4246_v10, %v4245_v4  ;;  %v4259_v50 = vld [vmem:[#allocation38_spill] sm:$0xff] }
 0x1e1   : > { %v1777_v56 = vmul.f32 %v1713_v26, %v1713_v26  ;;  %v1647_v2 = vsub.f32 1.0, %v1445_v32  ;;  %v1435_v58 = vsel %vm1434_vm5, %v4243_v59, %v1433_v7  ;;  %vm1427_vm1 = vcmp.eq.f32.partialorder %v4245_v4, inf  ;;  %v363_v7 = vld [vmem:[%s337_s17] sm:$0x3] }
 0x1e2   : > { %v1776_v38 = vmul.f32 %v1712_v33, %v1712_v33  ;;  %v1438_v25 = vsel %vm1436_vm7, %v1437_v11, %v1435_v58  ;;  %v1428_v31 = vsel %vm1427_vm1, %v4245_v4, %v1426_v47  ;;  %vm1429_vm2 = vcmp.eq.f32.partialorder %v4245_v4, 0.0 }
 0x1e3   : > { %1863 = vmatpush2.msra.mxu1 %v1777_v56  ;;  %v1711_v3 = vmax.f32 %v1647_v2, 0.0  ;;  %v1646_v34 = vsub.f32 1.0, %v1438_v25  ;;  %v1430_v53 = vand.u32 2147483648, %v4245_v4  ;;  %v1419_v12 = vmul.f32 %v4248_v62, %v4247_v8 }
 0x1e4   : > { %1864 = vmatprep.subr.mxu1 %v1776_v38  ;;  %vm1420_vm3 = vcmp.eq.f32.partialorder %v4247_v8, inf  ;;  %vm1422_vm4 = vcmp.eq.f32.partialorder %v4247_v8, 0.0  ;;  %v1423_v16 = vand.u32 2147483648, %v4247_v8  ;;  %v1412_v55 = vmul.f32 %v4251_v49, %v4250_v27  ;;  %v364_v49 = vld [vmem:[%s342_s20] sm:$0x3] }
 0x1e5   : > { %v1775_v23 = vmul.f32 %v1711_v3, %v1711_v3  ;;  %v1710_v39 = vmax.f32 %v1646_v34, 0.0  ;;  %v1431_v6 = vsel %vm1429_vm2, %v1430_v53, %v1428_v31  ;;  %v1421_v17 = vsel %vm1420_vm3, %v4247_v8, %v1419_v12  ;;  %v4260_v8 = vld [vmem:[#allocation6_spill] sm:$0xff]  ;;  %v4261_v12 = vld [vmem:[#allocation5_spill] sm:$0xff] }
 0x1e6   : > { %v1645_v5 = vsub.f32 1.0, %v1431_v6  ;;  %v1424_v1 = vsel %vm1422_vm4, %v1423_v16, %v1421_v17  ;;  %vm1413_vm6 = vcmp.eq.f32.partialorder %v4250_v27, inf  ;;  %vm1415_vm8 = vcmp.eq.f32.partialorder %v4250_v27, 0.0 }
 0x1e7   : > { %1865 = vmatpush2.msra.mxu1 %v1775_v23  ;;  %v1774_v21 = vmul.f32 %v1710_v39, %v1710_v39  ;;  %v1644_v22 = vsub.f32 1.0, %v1424_v1  ;;  %v1414_v60 = vsel %vm1413_vm6, %v4250_v27, %v1412_v55  ;;  %v1416_v48 = vand.u32 2147483648, %v4250_v27 }
 0x1e8   : > { %v1709_v20 = vmax.f32 %v1645_v5, 0.0  ;;  %v1405_v0 = vmul.f32 %v4253_v14, %v4252_v15  ;;  %vm1406_vm9 = vcmp.eq.f32.partialorder %v4252_v15, inf  ;;  %vm1408_vm10 = vcmp.eq.f32.partialorder %v4252_v15, 0.0 }
 0x1e9   : > { %1866 = vmatprep.subr.mxu1 %v1774_v21  ;;  %v1708_v61 = vmax.f32 %v1644_v22, 0.0  ;;  %v1417_v18 = vsel %vm1415_vm8, %v1416_v48, %v1414_v60  ;;  %v1409_v19 = vand.u32 2147483648, %v4252_v15  ;;  %v1398_v63 = vmul.f32 %v4255_v54, %v4254_v45 }
 0x1ea   : > { %v1773_v28 = vmul.f32 %v1709_v20, %v1709_v20  ;;  %v1643_v42 = vsub.f32 1.0, %v1417_v18  ;;  %v1407_v40 = vsel %vm1406_vm9, %v4252_v15, %v1405_v0  ;;  %vm1399_vm11 = vcmp.eq.f32.partialorder %v4254_v45, inf }
 0x1eb   : > { %v1772_v51 = vmul.f32 %v1708_v61, %v1708_v61  ;;  %v1410_v13 = vsel %vm1408_vm10, %v1409_v19, %v1407_v40  ;;  %v1400_v9 = vsel %vm1399_vm11, %v4254_v45, %v1398_v63  ;;  %vm1401_vm12 = vcmp.eq.f32.partialorder %v4254_v45, 0.0 }
 0x1ec   : > { %1867 = vmatpush2.msra.mxu1 %v1773_v28  ;;  %v1707_v36 = vmax.f32 %v1643_v42, 0.0  ;;  %v1642_v41 = vsub.f32 1.0, %v1410_v13  ;;  %v1402_v35 = vand.u32 2147483648, %v4254_v45  ;;  %v1391_v46 = vmul.f32 %v4257_v44, %v4256_v52 }
 0x1ed   : > { %1868 = vmatprep.subr.mxu1 %v1772_v51  ;;  %vm1392_vm13 = vcmp.eq.f32.partialorder %v4256_v52, inf  ;;  %vm1394_vm14 = vcmp.eq.f32.partialorder %v4256_v52, 0.0  ;;  %v1395_v30 = vand.u32 2147483648, %v4256_v52  ;;  %v1384_v24 = vmul.f32 %v4259_v50, %v4258_v43 }
 0x1ee   : > { %v1771_v29 = vmul.f32 %v1707_v36, %v1707_v36  ;;  %v1706_v37 = vmax.f32 %v1642_v41, 0.0  ;;  %v1403_v26 = vsel %vm1401_vm12, %v1402_v35, %v1400_v9  ;;  %v1393_v59 = vsel %vm1392_vm13, %v4256_v52, %v1391_v46 }
 0x1ef   : > { %v1641_v33 = vsub.f32 1.0, %v1403_v26  ;;  %v1396_v32 = vsel %vm1394_vm14, %v1395_v30, %v1393_v59  ;;  %vm1385_vm15 = vcmp.eq.f32.partialorder %v4258_v43, inf  ;;  %vm1387_vm0 = vcmp.eq.f32.partialorder %v4258_v43, 0.0 }
 0x1f0   : > { %1869 = vmatpush2.msra.mxu1 %v1771_v29  ;;  %v1770_v11 = vmul.f32 %v1706_v37, %v1706_v37  ;;  %v1640_v4 = vsub.f32 1.0, %v1396_v32  ;;  %v1386_v10 = vsel %vm1385_vm15, %v4258_v43, %v1384_v24  ;;  %v1388_v47 = vand.u32 2147483648, %v4258_v43 }
 0x1f1   : > { %v1705_v56 = vmax.f32 %v1641_v33, 0.0  ;;  %vm365_vm5 = vcmp.ne.s32.totalorder %v363_v7, 4294967295  ;;  %vm366_vm7 = vcmp.ne.s32.totalorder %v363_v7, 1  ;;  %vm368_vm1 = vcmp.lt.f32.partialorder %v3902_v57, 1.0 }
 0x1f2   : > { %1870 = vmatprep.subr.mxu1 %v1770_v11  ;;  %v1704_v2 = vmax.f32 %v1640_v4, 0.0  ;;  %v1389_v58 = vsel %vm1387_vm0, %v1388_v47, %v1386_v10  ;;  %vm367_vm2 = vmand %vm365_vm5, %vm366_vm7  ;;  %v2507_v3 = vmov 0.0   ;;  %vm372_vm4 = vcmp.ne.s32.totalorder %v364_v49, 4294967295 }
 0x1f3   : > { %v1769_v38 = vmul.f32 %v1705_v56, %v1705_v56  ;;  %v1639_v25 = vsub.f32 1.0, %v1389_v58  ;;  %vm369_vm3 = vmand %vm367_vm2, %vm368_vm1  ;;  %vm373_vm6 = vcmp.ne.s32.totalorder %v364_v49, 0  ;;  %vm1894_vm9 = vcmask 1040384  }
 0x1f4   : > { %v1768_v31 = vmul.f32 %v1704_v2, %v1704_v2  ;;  %v2108_v34 = vsel %vm369_vm3, 1.0, %v2507_v3  ;;  %vm374_vm8 = vmand %vm372_vm4, %vm373_vm6  ;;  %v4262_v48 = vlaneseq }
 0x1f5   : > { %1871 = vmatpush2.msra.mxu1 %v1769_v38  ;;  %v1703_v53 = vmax.f32 %v1639_v25, 0.0  ;;  %v1807_v62 = vrot.slane %v2108_v34, %v4260_v8  ;;  %v1803_v16 = vrot.slane %v2108_v34, %v4261_v12  ;;  %v2109_v55 = vsel %vm374_vm8, 1.0, %v2507_v3 }
 0x1f6   : > { %1872 = vmatprep.subr.mxu1 %v1768_v31  ;;  %v1885_v23 = vrot.slane %v2109_v55, %v4261_v12  ;;  %v1889_v39 = vrot.slane %v2109_v55, %v4260_v8  ;;  %v1901_v20 = vand.u32 127, %v4262_v48 }
 0x1f7   : > { %v1767_v27 = vmul.f32 %v1703_v53, %v1703_v53  ;;  %1874 = vmatprep.mubr.f32.mxu1 %v1807_v62 }
 0x1f8   : > { %vm1902_vm10 = vcmp.eq.s32.totalorder %v1901_v20, 0 }
 0x1f9   : > { %1873 = vmatpush2.msra.mxu1 %v1767_v27 }
 0x1fa   : > { %1875 = vmatmul.mubr.f32.vlgmr.msra.gmra.mxu1 %v1803_v16 }
 0x2ba   : > { %v1876_v6 = vpop.f32.mrf.mxu1 }
 0x2bb   : > { %v1892_v17 = vmul.f32 %v1885_v23, %v1876_v6 }
 0x2bc   : > { %v1878_v5 = vpop.f32.mrf.mxu1 }
 0x2bd   : > { %v1893_v1 = vmul.f32 %v1889_v39, %v1878_v5  ;;  %v1895_v21 = vsel %vm1894_vm9, %v1892_v17, 0.0 }
 0x2bf   : > { %v1896_v22 = vsel %vm1894_vm9, %v1893_v1, 0.0 }
 0x2c0   : > { %v1897_v60 = vadd.f32 %v1896_v22, %v1895_v21 }
 0x2c2   : > { %1898 = vadd.xlane.f32.xlu0 %v1897_v60 }
 0x348   : > { %1907 = sbr.rel (%p2126_p2) target bundleno = 1005 (0x3ed), region = 48 }
 0x34b   : > { %v1899_v15 = vpop.xlane.xlu0 %1898 }
 0x34c   : > { %v1903_v14 = vsel %vm1902_vm10, %v1899_v15, 0.0 }
 0x34d   : > { %vm1908_vm11 = vcmp.ne.s32.totalorder %v363_v7, 0  ;;  %v1946_v0 = vsel %vm1894_vm9, %v1803_v16, 0.0  ;;  %v1947_v61 = vsel %vm1894_vm9, %v1807_v62, 0.0  ;;  %v2508_v19 = vmov 0.0   ;;  %v4263_v28 = vld [vmem:[#allocation5_spill] sm:$0xff]  ;;  %v4264_v40 = vld [vmem:[#allocation6_spill] sm:$0xff] }
 0x34e   : > { %vm1909_vm12 = vmand %vm365_vm5, %vm1908_vm11  ;;  %v1948_v18 = vadd.f32 %v1947_v61, %v1946_v0  ;;  %vm1951_vm13 = vcmp.eq.s32.totalorder %v1901_v20, 1  ;;  %vm1954_vm14 = vcmp.eq.s32.totalorder %v1901_v20, 2  ;;  %vm1957_vm15 = vcmp.eq.s32.totalorder %v1901_v20, 3 }
 0x34f   : > { %v2127_v45 = vsel %vm1909_vm12, 1.0, %v2508_v19 }
 0x350   : > { %v1912_v54 = vmul.f32 %v2127_v45, %v3902_v57  ;;  %1949 = vadd.xlane.f32.xlu1 %v1948_v18  ;;  %v1934_v42 = vrot.slane %v2127_v45, %v4263_v28  ;;  %v1938_v51 = vrot.slane %v2127_v45, %v4264_v40 }
 0x352   : > { %v1913_v63 = vmul.f32 %v1912_v54, %v3902_v57  ;;  %v1941_v35 = vsel %vm1894_vm9, %v1934_v42, 0.0  ;;  %v1942_v52 = vsel %vm1894_vm9, %v1938_v51, 0.0 }
 0x353   : > { %v1943_v46 = vadd.f32 %v1942_v52, %v1941_v35 }
 0x354   : > { %v1918_v13 = vrot.slane %v1913_v63, %v4263_v28  ;;  %v1922_v9 = vrot.slane %v1913_v63, %v4264_v40 }
 0x356   : > { %v1925_v36 = vsel %vm1894_vm9, %v1918_v13, 0.0  ;;  %v1926_v41 = vsel %vm1894_vm9, %v1922_v9, 0.0 }
 0x357   : > { %v1927_v44 = vadd.f32 %v1926_v41, %v1925_v36 }
 0x359   : > { %1928 = vadd.xlane.f32.xlu0 %v1927_v44 }
 0x35d   : > { %1944 = vadd.xlane.f32.xlu0 %v1943_v46 }
 0x3d9   : > { %v1950_v50 = vpop.xlane.xlu1 %1949 }
 0x3da   : > { %v1958_v26 = vsel %vm1957_vm15, %v1950_v50, 0.0 }
 0x3e2   : > { %v1929_v30 = vpop.xlane.xlu0 %1928 }
 0x3e3   : > { %v1952_v43 = vsel %vm1951_vm13, %v1929_v30, 0.0 }
 0x3e4   : > { %v1953_v24 = vadd.f32 %v1952_v43, %v1903_v14 }
 0x3e6   : > { %v1945_v29 = vpop.xlane.xlu0 %1944 }
 0x3e7   : > { %v1955_v37 = vsel %vm1954_vm14, %v1945_v29, 0.0 }
 0x3e8   : > { %v1956_v59 = vadd.f32 %v1955_v37, %v1953_v24 }
 0x3ea   : > { %v1959_v57 = vadd.f32 %v1958_v26, %v1956_v59 }
 0x3ec   : > { %1960 = vst [vmem:[%s3923_s15] sm:$0x1] %v1959_v57 }
 0x3ed PF: > { %p2128_p4 = scmp.le.s32.totalorder %s2489_s24, 0 }
 0x3ef   : > { %1964 = sbr.rel (%p2128_p4) target bundleno = 1016 (0x3f8), region = 52 }
 0x3f4   : > { %v1965_v7 = vld [vmem:[%s3923_s15] sm:$0x1] }
 0x3f5   : > { %v1966_v33 = vadd.f32 %v1965_v7, %v1903_v14 }
 0x3f7   : > { %1967 = vst [vmem:[%s3923_s15] sm:$0x1] %v1966_v33 }
 0x3f8 PF: > { %s2129_s29 = sshll.u32 %s2493_s25, 4  ;;  %s1981_s16 = sshll.u32 %s3923_s15, 4  ;;  %s1982_s16 = int_to_ptr.vmem [resolvable:$true] %s1981_s16 }
 0x3f9   : > { %s1979_s12 = scalar_lea.hbm %s3996_s6, %s2129_s29  ;;  %s1969_s24 = scalar_lea.sflag [#allocation3], %s327_s14 }
 0x3fa   : > { %s2413_s17 = scalar_lea.vmem %s1982_s16, 16  ;;  %s2509_s18 = smov [#allocation2]  }
 0x3fb   : > { %p2414_p5 = scmp.ne.s32.totalorder %s1982_s16, %s2413_s17  ;;  %s2417_s19 = sshll.u32 %s2509_s18, 4  ;;  %s2418_s19 = int_to_ptr.vmem [resolvable:$false] %s2417_s19 }
 0x3fc   : > { %s2419_s20 = scalar_lea.vmem %s2418_s19, 32  ;;  %p2420_p8 = scmp.lt.s32.totalorder %s1982_s16, %s2418_s19 }
 0x3fd   : > { %p2415_p6 = pnand %p2414_p5, %p2594_p3  ;;  %p2421_p10 = scmp.lt.s32.totalorder %s2419_s20, %s2413_s17 }
 0x3ff   : > { %p2416_p7 = pneg %p2415_p6  ;;  %p2422_p11 = por %p2421_p10, %p2420_p8 }
 0x401   : > { %p2423_p12 = pnand %p2422_p11, %p2416_p7 }
 0x403   : > { %2426 = shalt.err (!%p2423_p12)
}
 0x404   : > { %s2427_s25 = scalar_lea.hbm %s1979_s12, 16  ;;  %s2431_s29 = scalar_lea.hbm %s3996_s6, 32 }
 0x405   : > { %p2428_p13 = scmp.ne.s32.totalorder %s1979_s12, %s2427_s25  ;;  %p2432_p2 = scmp.lt.s32.totalorder %s1979_s12, %s3996_s6 }
 0x406   : > { %p2433_p4 = scmp.lt.s32.totalorder %s2431_s29, %s2427_s25 }
 0x407   : > { %p2429_p0 = pnand %p2428_p13, %p2594_p3 }
 0x408   : > { %p2434_p5 = por %p2433_p4, %p2432_p2 }
 0x409   : > { %p2430_p1 = pneg %p2429_p0 }
 0x40b   : > { %p2435_p6 = pnand %p2434_p5, %p2430_p1 }
 0x40d   : > { %2438 = shalt.err (!%p2435_p6)
}
 0x40e   : > { %2212 = dma.vmem_to_hbm [thread:$0]  (%p2594_p3), %s1982_s16, 16, %s1979_s12, %s1969_s24  }
 0x40f PF: > { %p2218_p7 = scmp.ge.s32.totalorder %s2505_s28, 2  ;;  %s1993_s17 = sand.u32 1, %s2477_s21  }
 0x410   : > { %s1994_s18 = scalar_lea.sflag [#allocation3], %s1993_s17 }
 0x411   : > { %p2215_p8 = pnand %p2218_p7, %p2604_p9 }
 0x413   : > { %p2216_p10 = pneg %p2215_p8 }
 0x415   : > { %2472 = dma.done.wait (%p2216_p10), %s1994_s18, 16  }
 0x416   : > { %2474 = vsyncadd (%p2216_p10), %s1994_s18, 4294967280  ;;  %s19_s28 = sadd.s32 1, %s2505_s28   ;;  %s4265_s21 = smov %s2481_s22 }
 0x417   : > { %p16_p11 = scmp.ge.s32.totalorder %s19_s28, 6   ;;  %s4266_s22 = smov %s2485_s23 }
 0x418   : > { %s4267_s23 = smov %s2612_s13  ;;  %s4268_s24 = smov %s2497_s26 }
 0x419   : > { %s4269_s25 = smov %s2501_s27  ;;  %s4270_s26 = smov %s4273_s7 }
 0x41a   : > { %s4271_s27 = smov %s4277_s8  ;;  %18 = sbr.rel (!%p16_p11) target bundleno = 5 (0x5), region = 102 }
 0x41f   :  { %1998 = vsyncpa [#allocation3], 1 }
 0x420   :  { %2000 = vsyncpa [#allocation3 + $0x1], 1 }

</bundles_post_ra>
